<compile_context>
chip_gen: v7x
topology: tpu7x:2x2x1
jax: 0.10.0
libtpu: 0.0.40
codegen_flags: <defaults>
</compile_context>

<pallas_src>
import functools
import math

import jax
import jax.numpy as jnp
from jax.experimental import pallas as pl
from jax.experimental.pallas import tpu as pltpu


def _cross_attention_kernel(q_ref, k_ref, v_ref, me_ref, mh_ref,
                            wq_ref, bq_ref, wk_ref, bk_ref,
                            wv_ref, bv_ref, wo_ref, bo_ref,
                            out_ref, *, num_heads, head_dim, seq_q, seq_k,
                            block_b, use_approx_reciprocal):
    D = num_heads * head_dim
    inv_sqrt_hd = 1.0 / math.sqrt(head_dim)

    # ---- QKV projections: fat-M 2-D MXU matmuls, fp32 accumulation. ----
    # TODO(synk): when seq_q/seq_k are not multiples of 8 these reshapes cost a VMEM
    # relayout; pad the sequence dims in the wrapper for that case.
    q2 = q_ref[...].reshape(block_b * seq_q, D)
    k2 = k_ref[...].reshape(block_b * seq_k, D)
    v2 = v_ref[...].reshape(block_b * seq_k, D)

    Q = (jnp.dot(q2, wq_ref[...], preferred_element_type=jnp.float32)
         + bq_ref[...]) * inv_sqrt_hd                       # score scale folded into Q
    K = jnp.dot(k2, wk_ref[...], preferred_element_type=jnp.float32) + bk_ref[...]
    V = jnp.dot(v2, wv_ref[...], preferred_element_type=jnp.float32) + bv_ref[...]

    Qb = Q.reshape(block_b, seq_q, D)
    Kb = K.reshape(block_b, seq_k, D)
    Vb = V.reshape(block_b, seq_k, D)

    # ---- All-head scores with ONE batched matmul (no per-head lane slices). ----
    # Row (h*seq_q + q) of Qe is Q[b, q, :] with every lane outside head h zeroed, so
    # contracting it against the full-D K gives exactly head h's scores for query q.
    if seq_q == 1:
        Qe = Qb * me_ref[...]                               # (bb, 1, D) * (H, D) -> (bb, H, D)
    else:
        Qrep = jnp.concatenate([Qb] * num_heads, axis=1)    # (bb, H*Sq, D), sublane concat
        Qe = Qrep * me_ref[...]                             # per-head lane mask (constant)

    s = jnp.einsum("bmd,bkd->bmk", Qe, Kb,
                   preferred_element_type=jnp.float32)      # (bb, H*Sq, Sk)

    # ---- Row softmax; fold the mean over the query sequence into the weights. ----
    s = s - jnp.max(s, axis=-1, keepdims=True)
    p = jnp.exp(s)
    denom = jnp.sum(p, axis=-1, keepdims=True)
    if use_approx_reciprocal:
        r = pl.reciprocal(denom, approx=True)               # EUP seed ...
        r = r * (2.0 - denom * r)                           # ... + one Newton step
    else:
        r = 1.0 / denom                                     # exact-divide fallback
    p = p * (r * (1.0 / seq_q))                             # softmax + 1/Sq in one pass
    if seq_q == 1:
        pbar = p                                            # (bb, H, Sk)
    else:
        pbar = jnp.sum(p.reshape(block_b, num_heads, seq_q, seq_k), axis=2)

    # ---- mean_q(P) @ V for all heads with ONE batched matmul. ----
    o_full = jnp.einsum("bhk,bkd->bhd", pbar, Vb,
                        preferred_element_type=jnp.float32)  # (bb, H, D)
    # Keep each head's own head_dim lanes and sum over the head (sublane) axis:
    # this assembles the dense (bb, D) head-concatenated output with no lane concat.
    o_mean = jnp.sum(o_full * mh_ref[...], axis=1)           # (bb, D)

    # ---- Single dense K=D output projection (sequence mean already folded). ----
    out_ref[...] = (jnp.dot(o_mean, wo_ref[...], preferred_element_type=jnp.float32)
                    + bo_ref[...])


def _chip_info():
    """Best-effort chip introspection; falls back to conservative defaults."""
    kind = ""
    try:
        kind = jax.devices()[0].device_kind.lower()
    except Exception:
        pass
    # v2/v3/v5e-class chips have 128-wide MXUs; v4/v5p/v6e/v7x like ~256-row M tiles.
    small_mxu = any(t in kind for t in ("v2", "v3", "v5 lite", "v5e", "v5lite"))
    target_rows = 128 if small_mxu else 256
    # Chips presenting 2 TensorCores per device want >= 2 grid steps to shard.
    two_cores = any(t in kind for t in ("v4", "v5p", "v7"))
    try:
        phys_vmem = int(pltpu.get_tpu_info().vmem_capacity_bytes)
    except Exception:
        phys_vmem = 64 * 1024 * 1024        # most restrictive modern chip (v7x)
    return target_rows, two_cores, phys_vmem


def _step_vmem_bytes(bb, Sq, Sk, D, H, *, in_bytes, w_bytes, single_buffer_weights):
    """Rough per-grid-step VMEM footprint of the kernel (buffers + intermediates)."""
    rows_in = bb * (Sq + 2 * Sk)
    wbuf = 1 if single_buffer_weights else 2
    return (2 * rows_in * D * in_bytes                   # double-buffered activation inputs
            + 2 * bb * D * 4                             # double-buffered output block
            + wbuf * (4 * D * D * w_bytes + 4 * D * 4)   # weights + biases
            + wbuf * (H * Sq + H) * D * 4                # head lane masks
            + 4 * (rows_in * D                           # fp32 Q/K/V
                   + bb * H * Sq * D                     # head-replicated masked Q
                   + 2 * bb * H * Sq * Sk                # scores + probabilities
                   + bb * H * Sk                         # mean-folded weights
                   + bb * H * D + 2 * bb * D))           # head outputs + projection


def _choose_block_b(B, Sq, Sk, D, H, *, target_rows, two_cores, vmem_budget,
                    in_bytes, w_bytes, single_buffer_weights):
    """Batch block: multiple of 8 (or B itself), ~target_rows fat M, VMEM-feasible,
    and >= 2 grid steps on 2-TensorCore chips when the batch allows it."""
    cands = sorted({B} | {d for d in range(8, B, 8) if B % d == 0}, reverse=True)
    if two_cores and B >= 16:
        halves = [c for c in cands if c <= B // 2]
        if halves:
            cands = halves
    target_bb = max(1, target_rows // max(Sq, 1))

    def fits(bb):
        return _step_vmem_bytes(bb, Sq, Sk, D, H, in_bytes=in_bytes, w_bytes=w_bytes,
                                single_buffer_weights=single_buffer_weights) <= vmem_budget

    feasible = [c for c in cands if fits(c)] or cands
    under = [c for c in feasible if c <= target_bb]
    return under[0] if under else feasible[-1]


def cross_attention(query, key, value, params, num_heads, *, block_b=None,
                    use_approx_reciprocal=True, cast_to_bf16=False):
    B, Sq, D = query.shape
    _, Sk, _ = key.shape
    head_dim = D // num_heads
    assert head_dim * num_heads == D, "dim must be divisible by num_heads"
    wq, bq, wk, bk, wv, bv, wo, bo = params

    # Optional bf16 activations/weights (2x MXU, half the weight VMEM/DMA bytes);
    # accumulation stays fp32 in-kernel, but expect looser tolerance than fp32.
    if cast_to_bf16:
        cast = lambda a: a.astype(jnp.bfloat16)
        query, key, value = cast(query), cast(key), cast(value)
        wq, wk, wv, wo = cast(wq), cast(wk), cast(wv), cast(wo)
    in_bytes = query.dtype.itemsize
    w_bytes = wq.dtype.itemsize

    target_rows, two_cores, phys_vmem = _chip_info()
    vmem_budget = int(0.7 * min(phys_vmem, 128 * 1024 * 1024))

    if block_b is None:
        block_b = _choose_block_b(B, Sq, Sk, D, num_heads, target_rows=target_rows,
                                  two_cores=two_cores, vmem_budget=vmem_budget,
                                  in_bytes=in_bytes, w_bytes=w_bytes,
                                  single_buffer_weights=True)
    assert B % block_b == 0, "batch block must divide B"
    assert block_b == B or block_b % 8 == 0, \
        "block_b must equal B or be a multiple of 8 (TPU (8,128) tiling)"
    grid = (B // block_b,)

    # Per-head lane masks (trace-time constants).
    # mask_h[h, c] = 1 iff feature lane c belongs to head h; mask_e repeats each head
    # row Sq times to match the head-replicated Q rows inside the kernel.
    head_of_lane = jnp.arange(D, dtype=jnp.int32) // head_dim
    mask_h = (head_of_lane[None, :] ==
              jnp.arange(num_heads, dtype=jnp.int32)[:, None]).astype(jnp.float32)
    mask_e = jnp.repeat(mask_h, Sq, axis=0) if Sq > 1 else mask_h      # (H*Sq, D)

    kernel = functools.partial(
        _cross_attention_kernel,
        num_heads=num_heads, head_dim=head_dim, seq_q=Sq, seq_k=Sk,
        block_b=block_b, use_approx_reciprocal=use_approx_reciprocal)

    footprint = _step_vmem_bytes(block_b, Sq, Sk, D, num_heads, in_bytes=in_bytes,
                                 w_bytes=w_bytes, single_buffer_weights=True)
    vmem_limit = int(min(min(phys_vmem, 128 * 1024 * 1024),
                         max(32 * 1024 * 1024, 1.3 * footprint)))

    flops = (2 * B * (Sq + 2 * Sk) * D * D           # QKV projections
             + 2 * B * num_heads * Sq * Sk * D       # head-replicated score matmul
             + 2 * B * num_heads * Sk * D            # mean-folded P @ V
             + 2 * B * D * D)                        # output projection
    bytes_accessed = (in_bytes * (query.size + key.size + value.size)
                      + w_bytes * 4 * D * D + 4 * (4 * D + B * D))
    cost = pl.CostEstimate(flops=flops,
                           transcendentals=B * num_heads * Sq * Sk,
                           bytes_accessed=bytes_accessed)

    # TODO(synk): for very large D, add a trailing "arbitrary" grid axis tiling the
    # weight K/N dims with a VMEM accumulator so the four (D, D) weights never need to
    # be VMEM-resident at once (v7x 64 MiB).

    def build(single_buffer_weights):
        const_kwargs = {}
        if single_buffer_weights:
            # Constant-index blocks never refetch: single-buffer them to halve
            # weight/mask VMEM (decides whether large D fits v7x's 64 MiB).
            const_kwargs = dict(pipeline_mode=pl.Buffered(buffer_count=1))
        w_spec = pl.BlockSpec((D, D), lambda i: (0, 0), **const_kwargs)
        b_spec = pl.BlockSpec((1, D), lambda i: (0, 0), **const_kwargs)
        me_spec = pl.BlockSpec(mask_e.shape, lambda i: (0, 0), **const_kwargs)
        mh_spec = pl.BlockSpec(mask_h.shape, lambda i: (0, 0), **const_kwargs)
        return pl.pallas_call(
            kernel,
            out_shape=jax.ShapeDtypeStruct((B, D), jnp.float32),
            grid_spec=pltpu.PrefetchScalarGridSpec(
                num_scalar_prefetch=0,
                grid=grid,
                in_specs=[
                    pl.BlockSpec((block_b, Sq, D), lambda i: (i, 0, 0)),   # query
                    pl.BlockSpec((block_b, Sk, D), lambda i: (i, 0, 0)),   # key
                    pl.BlockSpec((block_b, Sk, D), lambda i: (i, 0, 0)),   # value
                    me_spec, mh_spec,                                      # head masks
                    w_spec, b_spec,                                        # q proj
                    w_spec, b_spec,                                        # k proj
                    w_spec, b_spec,                                        # v proj
                    w_spec, b_spec,                                        # out proj
                ],
                out_specs=pl.BlockSpec((block_b, D), lambda i: (i, 0)),
            ),
            compiler_params=pltpu.CompilerParams(
                dimension_semantics=("parallel",),
                vmem_limit_bytes=vmem_limit),
            cost_estimate=cost,
        )

    args = (query, key, value, mask_e, mask_h,
            wq, bq.reshape(1, D), wk, bk.reshape(1, D),
            wv, bv.reshape(1, D), wo, bo.reshape(1, D))
    try:
        return build(single_buffer_weights=True)(*args)
    except Exception:
        # Fallback for jax versions where pl.Buffered(1) is not accepted on BlockSpecs.
        return build(single_buffer_weights=False)(*args)


def cross_attention_reference(query, key, value, params, num_heads):
    """Pure-JAX reference matching the PyTorch forward."""
    B, Sq, D = query.shape
    head_dim = D // num_heads
    wq, bq, wk, bk, wv, bv, wo, bo = params
    Q = (query @ wq + bq).reshape(B, Sq, num_heads, head_dim).transpose(0, 2, 1, 3)
    K = (key @ wk + bk).reshape(B, -1, num_heads, head_dim).transpose(0, 2, 1, 3)
    V = (value @ wv + bv).reshape(B, -1, num_heads, head_dim).transpose(0, 2, 1, 3)
    attn = jnp.einsum("bhqd,bhkd->bhqk", Q, K) / math.sqrt(head_dim)
    attn = jax.nn.softmax(attn, axis=-1)
    out = jnp.einsum("bhqk,bhkd->bhqd", attn, V)
    out = out.transpose(0, 2, 1, 3).reshape(B, Sq, D)
    out = out @ wo + bo
    return out[:, 0, :] if Sq == 1 else out.mean(axis=1)


if __name__ == "__main__":
    D, H = 32, 8

    key0 = jax.random.PRNGKey(0)
    keys = jax.random.split(key0, 16)

    # Deterministic synthetic parameters (nn.Linear(dim, dim) x4).
    scale = 1.0 / math.sqrt(D)
    wq = jax.random.uniform(keys[0], (D, D), jnp.float32, -scale, scale)
    bq = jax.random.uniform(keys[1], (D,), jnp.float32, -scale, scale)
    wk = jax.random.uniform(keys[2], (D, D), jnp.float32, -scale, scale)
    bk = jax.random.uniform(keys[3], (D,), jnp.float32, -scale, scale)
    wv = jax.random.uniform(keys[4], (D, D), jnp.float32, -scale, scale)
    bv = jax.random.uniform(keys[5], (D,), jnp.float32, -scale, scale)
    wo = jax.random.uniform(keys[6], (D, D), jnp.float32, -scale, scale)
    bo = jax.random.uniform(keys[7], (D,), jnp.float32, -scale, scale)
    params = (wq, bq, wk, bk, wv, bv, wo, bo)

    # Case 1: Sq = Sk = 8  (sequence-mean path of the PyTorch module).
    B, Sq, Sk = 2, 8, 8
    query = jax.random.normal(keys[8], (B, Sq, D), jnp.float32)
    key_in = jax.random.normal(keys[9], (B, Sk, D), jnp.float32)
    value = jax.random.normal(keys[10], (B, Sk, D), jnp.float32)

    out = jax.block_until_ready(cross_attention(query, key_in, value, params, H))
    ref = cross_attention_reference(query, key_in, value, params, H)
    assert out.shape == (B, D)
    assert jnp.allclose(out, ref, atol=1e-5, rtol=1e-5), "mismatch vs reference (Sq=8)"

    # Case 2: Sq = 1  (squeeze(1) path of the PyTorch module).
    q1 = jax.random.normal(keys[11], (B, 1, D), jnp.float32)
    out1 = jax.block_until_ready(cross_attention(q1, key_in, value, params, H))
    ref1 = cross_attention_reference(q1, key_in, value, params, H)
    assert out1.shape == (B, D)
    assert jnp.allclose(out1, ref1, atol=1e-5, rtol=1e-5), "mismatch vs reference (Sq=1)"

    print("KERNEL_OK")
</pallas_src>

<mosaic_0001>
module attributes {stable_mosaic.version = 11 : i64} {
  func.func @_cross_attention_kernel(%arg0: i32, %arg1: memref<2x8x32xf32, #tpu.memory_space<vmem>>, %arg2: memref<2x8x32xf32, #tpu.memory_space<vmem>>, %arg3: memref<2x8x32xf32, #tpu.memory_space<vmem>>, %arg4: memref<64x32xf32, #tpu.memory_space<vmem>>, %arg5: memref<8x32xf32, #tpu.memory_space<vmem>>, %arg6: memref<32x32xf32, #tpu.memory_space<vmem>>, %arg7: memref<1x32xf32, #tpu.memory_space<vmem>>, %arg8: memref<32x32xf32, #tpu.memory_space<vmem>>, %arg9: memref<1x32xf32, #tpu.memory_space<vmem>>, %arg10: memref<32x32xf32, #tpu.memory_space<vmem>>, %arg11: memref<1x32xf32, #tpu.memory_space<vmem>>, %arg12: memref<32x32xf32, #tpu.memory_space<vmem>>, %arg13: memref<1x32xf32, #tpu.memory_space<vmem>>, %arg14: memref<2x32xf32, #tpu.memory_space<vmem>>) attributes {dimension_semantics = [#tpu.dimension_semantics<parallel>], iteration_bounds = array<i64: 1>, scalar_prefetch = 0 : i64, scratch_operands = 0 : i64, tpu.core_type = #tpu.core_type<tc>, window_params = [{transform_indices = @transform_0, window_bounds = array<i64: 2, 8, 32>}, {transform_indices = @transform_1, window_bounds = array<i64: 2, 8, 32>}, {transform_indices = @transform_2, window_bounds = array<i64: 2, 8, 32>}, {pipeline_mode = #tpu.pipeline_mode<synchronous>, transform_indices = @transform_3, window_bounds = array<i64: 64, 32>}, {pipeline_mode = #tpu.pipeline_mode<synchronous>, transform_indices = @transform_4, window_bounds = array<i64: 8, 32>}, {pipeline_mode = #tpu.pipeline_mode<synchronous>, transform_indices = @transform_5, window_bounds = array<i64: 32, 32>}, {pipeline_mode = #tpu.pipeline_mode<synchronous>, transform_indices = @transform_6, window_bounds = array<i64: 1, 32>}, {pipeline_mode = #tpu.pipeline_mode<synchronous>, transform_indices = @transform_7, window_bounds = array<i64: 32, 32>}, {pipeline_mode = #tpu.pipeline_mode<synchronous>, transform_indices = @transform_8, window_bounds = array<i64: 1, 32>}, {pipeline_mode = #tpu.pipeline_mode<synchronous>, transform_indices = @transform_9, window_bounds = array<i64: 32, 32>}, {pipeline_mode = #tpu.pipeline_mode<synchronous>, transform_indices = @transform_10, window_bounds = array<i64: 1, 32>}, {pipeline_mode = #tpu.pipeline_mode<synchronous>, transform_indices = @transform_11, window_bounds = array<i64: 32, 32>}, {pipeline_mode = #tpu.pipeline_mode<synchronous>, transform_indices = @transform_12, window_bounds = array<i64: 1, 32>}, {transform_indices = @transform_13, window_bounds = array<i64: 2, 32>}]} {
    %c0 = arith.constant 0 : index
    %c0_0 = arith.constant 0 : index
    %c0_1 = arith.constant 0 : index
    %0 = vector.load %arg1[%c0, %c0_0, %c0_1] : memref<2x8x32xf32, #tpu.memory_space<vmem>>, vector<2x8x32xf32>
    %1 = vector.shape_cast %0 : vector<2x8x32xf32> to vector<16x32xf32>
    %c0_2 = arith.constant 0 : index
    %c0_3 = arith.constant 0 : index
    %c0_4 = arith.constant 0 : index
    %2 = vector.load %arg2[%c0_2, %c0_3, %c0_4] : memref<2x8x32xf32, #tpu.memory_space<vmem>>, vector<2x8x32xf32>
    %3 = vector.shape_cast %2 : vector<2x8x32xf32> to vector<16x32xf32>
    %c0_5 = arith.constant 0 : index
    %c0_6 = arith.constant 0 : index
    %c0_7 = arith.constant 0 : index
    %4 = vector.load %arg3[%c0_5, %c0_6, %c0_7] : memref<2x8x32xf32, #tpu.memory_space<vmem>>, vector<2x8x32xf32>
    %5 = vector.shape_cast %4 : vector<2x8x32xf32> to vector<16x32xf32>
    %c0_8 = arith.constant 0 : index
    %c0_9 = arith.constant 0 : index
    %6 = vector.load %arg6[%c0_8, %c0_9] : memref<32x32xf32, #tpu.memory_space<vmem>>, vector<32x32xf32>
    %cst = arith.constant dense<0.000000e+00> : vector<16x32xf32>
    %7 = tpu.matmul %1, %6, %cst {dimension_numbers = #tpu.dot_dimension_numbers<[1], [0], [0], [1], [0, 0, 1, 1], [], []>} : vector<16x32xf32>, vector<32x32xf32>, vector<16x32xf32> -> vector<16x32xf32>
    %c0_10 = arith.constant 0 : index
    %c0_11 = arith.constant 0 : index
    %8 = vector.load %arg7[%c0_10, %c0_11] : memref<1x32xf32, #tpu.memory_space<vmem>>, vector<1x32xf32>
    %9 = vector.broadcast %8 : vector<1x32xf32> to vector<16x32xf32>
    %10 = arith.addf %7, %9 : vector<16x32xf32>
    %cst_12 = arith.constant 5.000000e-01 : f32
    %11 = vector.broadcast %cst_12 : f32 to vector<16x32xf32>
    %12 = arith.mulf %10, %11 : vector<16x32xf32>
    %c0_13 = arith.constant 0 : index
    %c0_14 = arith.constant 0 : index
    %13 = vector.load %arg8[%c0_13, %c0_14] : memref<32x32xf32, #tpu.memory_space<vmem>>, vector<32x32xf32>
    %cst_15 = arith.constant dense<0.000000e+00> : vector<16x32xf32>
    %14 = tpu.matmul %3, %13, %cst_15 {dimension_numbers = #tpu.dot_dimension_numbers<[1], [0], [0], [1], [0, 0, 1, 1], [], []>} : vector<16x32xf32>, vector<32x32xf32>, vector<16x32xf32> -> vector<16x32xf32>
    %c0_16 = arith.constant 0 : index
    %c0_17 = arith.constant 0 : index
    %15 = vector.load %arg9[%c0_16, %c0_17] : memref<1x32xf32, #tpu.memory_space<vmem>>, vector<1x32xf32>
    %16 = vector.broadcast %15 : vector<1x32xf32> to vector<16x32xf32>
    %17 = arith.addf %14, %16 : vector<16x32xf32>
    %c0_18 = arith.constant 0 : index
    %c0_19 = arith.constant 0 : index
    %18 = vector.load %arg10[%c0_18, %c0_19] : memref<32x32xf32, #tpu.memory_space<vmem>>, vector<32x32xf32>
    %cst_20 = arith.constant dense<0.000000e+00> : vector<16x32xf32>
    %19 = tpu.matmul %5, %18, %cst_20 {dimension_numbers = #tpu.dot_dimension_numbers<[1], [0], [0], [1], [0, 0, 1, 1], [], []>} : vector<16x32xf32>, vector<32x32xf32>, vector<16x32xf32> -> vector<16x32xf32>
    %c0_21 = arith.constant 0 : index
    %c0_22 = arith.constant 0 : index
    %20 = vector.load %arg11[%c0_21, %c0_22] : memref<1x32xf32, #tpu.memory_space<vmem>>, vector<1x32xf32>
    %21 = vector.broadcast %20 : vector<1x32xf32> to vector<16x32xf32>
    %22 = arith.addf %19, %21 : vector<16x32xf32>
    %23 = vector.shape_cast %12 : vector<16x32xf32> to vector<2x8x32xf32>
    %24 = vector.shape_cast %17 : vector<16x32xf32> to vector<2x8x32xf32>
    %25 = vector.shape_cast %22 : vector<16x32xf32> to vector<2x8x32xf32>
    %26 = tpu.concatenate %23, %23, %23, %23, %23, %23, %23, %23 in 1 : vector<2x8x32xf32>, vector<2x8x32xf32>, vector<2x8x32xf32>, vector<2x8x32xf32>, vector<2x8x32xf32>, vector<2x8x32xf32>, vector<2x8x32xf32>, vector<2x8x32xf32> -> vector<2x64x32xf32>
    %c0_23 = arith.constant 0 : index
    %c0_24 = arith.constant 0 : index
    %27 = vector.load %arg4[%c0_23, %c0_24] : memref<64x32xf32, #tpu.memory_space<vmem>>, vector<64x32xf32>
    %28 = vector.shape_cast %27 : vector<64x32xf32> to vector<1x64x32xf32>
    %29 = vector.broadcast %28 : vector<1x64x32xf32> to vector<2x64x32xf32>
    %30 = arith.mulf %26, %29 : vector<2x64x32xf32>
    "tpu.trace_start"() <{level = 10 : i32, message = "bmd,bkd->bmk"}> : () -> ()
    %cst_25 = arith.constant dense<0.000000e+00> : vector<2x64x8xf32>
    %31 = tpu.matmul %30, %24, %cst_25 {dimension_numbers = #tpu.dot_dimension_numbers<[2], [2], [1], [1], [0, 0, 0, 1, 1, 1], [0], [0]>} : vector<2x64x32xf32>, vector<2x8x32xf32>, vector<2x64x8xf32> -> vector<2x64x8xf32>
    "tpu.trace_stop"() : () -> ()
    %cst_26 = arith.constant dense<0xFF800000> : vector<2x64xf32>
    %32 = vector.multi_reduction <maximumf>, %31, %cst_26 [2] : vector<2x64x8xf32> to vector<2x64xf32>
    %33 = vector.shape_cast %32 : vector<2x64xf32> to vector<2x64x1xf32>
    %34 = vector.broadcast %33 : vector<2x64x1xf32> to vector<2x64x8xf32>
    %35 = arith.subf %31, %34 : vector<2x64x8xf32>
    %36 = math.exp %35 : vector<2x64x8xf32>
    %cst_27 = arith.constant dense<0.000000e+00> : vector<2x64xf32>
    %37 = vector.multi_reduction <add>, %36, %cst_27 [2] : vector<2x64x8xf32> to vector<2x64xf32>
    %38 = vector.shape_cast %37 : vector<2x64xf32> to vector<2x64x1xf32>
    %39 = tpu.reciprocal %38 {approx = true} : vector<2x64x1xf32> -> vector<2x64x1xf32>
    %40 = arith.mulf %38, %39 : vector<2x64x1xf32>
    %cst_28 = arith.constant 2.000000e+00 : f32
    %41 = vector.broadcast %cst_28 : f32 to vector<2x64x1xf32>
    %42 = arith.subf %41, %40 : vector<2x64x1xf32>
    %43 = arith.mulf %39, %42 : vector<2x64x1xf32>
    %cst_29 = arith.constant 1.250000e-01 : f32
    %44 = vector.broadcast %cst_29 : f32 to vector<2x64x1xf32>
    %45 = arith.mulf %43, %44 : vector<2x64x1xf32>
    %46 = vector.broadcast %45 : vector<2x64x1xf32> to vector<2x64x8xf32>
    %47 = arith.mulf %36, %46 : vector<2x64x8xf32>
    %48 = vector.shape_cast %47 : vector<2x64x8xf32> to vector<2x8x8x8xf32>
    %cst_30 = arith.constant dense<0.000000e+00> : vector<2x8x8xf32>
    %49 = vector.multi_reduction <add>, %48, %cst_30 [2] : vector<2x8x8x8xf32> to vector<2x8x8xf32>
    "tpu.trace_start"() <{level = 10 : i32, message = "bhk,bkd->bhd"}> : () -> ()
    %cst_31 = arith.constant dense<0.000000e+00> : vector<2x8x32xf32>
    %50 = tpu.matmul %49, %25, %cst_31 {dimension_numbers = #tpu.dot_dimension_numbers<[2], [1], [1], [2], [0, 0, 0, 1, 1, 2], [0], [0]>} : vector<2x8x8xf32>, vector<2x8x32xf32>, vector<2x8x32xf32> -> vector<2x8x32xf32>
    "tpu.trace_stop"() : () -> ()
    %c0_32 = arith.constant 0 : index
    %c0_33 = arith.constant 0 : index
    %51 = vector.load %arg5[%c0_32, %c0_33] : memref<8x32xf32, #tpu.memory_space<vmem>>, vector<8x32xf32>
    %52 = vector.shape_cast %51 : vector<8x32xf32> to vector<1x8x32xf32>
    %53 = vector.broadcast %52 : vector<1x8x32xf32> to vector<2x8x32xf32>
    %54 = arith.mulf %50, %53 : vector<2x8x32xf32>
    %cst_34 = arith.constant dense<0.000000e+00> : vector<2x32xf32>
    %55 = vector.multi_reduction <add>, %54, %cst_34 [1] : vector<2x8x32xf32> to vector<2x32xf32>
    %c0_35 = arith.constant 0 : index
    %c0_36 = arith.constant 0 : index
    %56 = vector.load %arg12[%c0_35, %c0_36] : memref<32x32xf32, #tpu.memory_space<vmem>>, vector<32x32xf32>
    %cst_37 = arith.constant dense<0.000000e+00> : vector<2x32xf32>
    %57 = tpu.matmul %55, %56, %cst_37 {dimension_numbers = #tpu.dot_dimension_numbers<[1], [0], [0], [1], [0, 0, 1, 1], [], []>} : vector<2x32xf32>, vector<32x32xf32>, vector<2x32xf32> -> vector<2x32xf32>
    %c0_38 = arith.constant 0 : index
    %c0_39 = arith.constant 0 : index
    %58 = vector.load %arg13[%c0_38, %c0_39] : memref<1x32xf32, #tpu.memory_space<vmem>>, vector<1x32xf32>
    %59 = vector.broadcast %58 : vector<1x32xf32> to vector<2x32xf32>
    %60 = arith.addf %57, %59 : vector<2x32xf32>
    %c0_40 = arith.constant 0 : index
    %c0_41 = arith.constant 0 : index
    %61 = vector.load %arg14[%c0_40, %c0_41] : memref<2x32xf32, #tpu.memory_space<vmem>>, vector<2x32xf32>
    tpu.vector_store %arg14[%c0_40, %c0_41], %60 {strides = array<i32>} : memref<2x32xf32, #tpu.memory_space<vmem>>, vector<2x32xf32>,
    return
  }
  func.func @transform_0(%arg0: i32) -> (i32, i32, i32) {
    %c0_i32 = arith.constant 0 : i32
    %c0_i32_0 = arith.constant 0 : i32
    %c0_i32_1 = arith.constant 0 : i32
    return %arg0, %c0_i32, %c0_i32_0 : i32, i32, i32
  }
  func.func @transform_1(%arg0: i32) -> (i32, i32, i32) {
    %c0_i32 = arith.constant 0 : i32
    %c0_i32_0 = arith.constant 0 : i32
    %c0_i32_1 = arith.constant 0 : i32
    return %arg0, %c0_i32, %c0_i32_0 : i32, i32, i32
  }
  func.func @transform_2(%arg0: i32) -> (i32, i32, i32) {
    %c0_i32 = arith.constant 0 : i32
    %c0_i32_0 = arith.constant 0 : i32
    %c0_i32_1 = arith.constant 0 : i32
    return %arg0, %c0_i32, %c0_i32_0 : i32, i32, i32
  }
  func.func @transform_3(%arg0: i32) -> (i32, i32) {
    %c0_i32 = arith.constant 0 : i32
    %c0_i32_0 = arith.constant 0 : i32
    %c0_i32_1 = arith.constant 0 : i32
    return %c0_i32, %c0_i32_0 : i32, i32
  }
  func.func @transform_4(%arg0: i32) -> (i32, i32) {
    %c0_i32 = arith.constant 0 : i32
    %c0_i32_0 = arith.constant 0 : i32
    %c0_i32_1 = arith.constant 0 : i32
    return %c0_i32, %c0_i32_0 : i32, i32
  }
  func.func @transform_5(%arg0: i32) -> (i32, i32) {
    %c0_i32 = arith.constant 0 : i32
    %c0_i32_0 = arith.constant 0 : i32
    %c0_i32_1 = arith.constant 0 : i32
    return %c0_i32, %c0_i32_0 : i32, i32
  }
  func.func @transform_6(%arg0: i32) -> (i32, i32) {
    %c0_i32 = arith.constant 0 : i32
    %c0_i32_0 = arith.constant 0 : i32
    %c0_i32_1 = arith.constant 0 : i32
    return %c0_i32, %c0_i32_0 : i32, i32
  }
  func.func @transform_7(%arg0: i32) -> (i32, i32) {
    %c0_i32 = arith.constant 0 : i32
    %c0_i32_0 = arith.constant 0 : i32
    %c0_i32_1 = arith.constant 0 : i32
    return %c0_i32, %c0_i32_0 : i32, i32
  }
  func.func @transform_8(%arg0: i32) -> (i32, i32) {
    %c0_i32 = arith.constant 0 : i32
    %c0_i32_0 = arith.constant 0 : i32
    %c0_i32_1 = arith.constant 0 : i32
    return %c0_i32, %c0_i32_0 : i32, i32
  }
  func.func @transform_9(%arg0: i32) -> (i32, i32) {
    %c0_i32 = arith.constant 0 : i32
    %c0_i32_0 = arith.constant 0 : i32
    %c0_i32_1 = arith.constant 0 : i32
    return %c0_i32, %c0_i32_0 : i32, i32
  }
  func.func @transform_10(%arg0: i32) -> (i32, i32) {
    %c0_i32 = arith.constant 0 : i32
    %c0_i32_0 = arith.constant 0 : i32
    %c0_i32_1 = arith.constant 0 : i32
    return %c0_i32, %c0_i32_0 : i32, i32
  }
  func.func @transform_11(%arg0: i32) -> (i32, i32) {
    %c0_i32 = arith.constant 0 : i32
    %c0_i32_0 = arith.constant 0 : i32
    %c0_i32_1 = arith.constant 0 : i32
    return %c0_i32, %c0_i32_0 : i32, i32
  }
  func.func @transform_12(%arg0: i32) -> (i32, i32) {
    %c0_i32 = arith.constant 0 : i32
    %c0_i32_0 = arith.constant 0 : i32
    %c0_i32_1 = arith.constant 0 : i32
    return %c0_i32, %c0_i32_0 : i32, i32
  }
  func.func @transform_13(%arg0: i32) -> (i32, i32) {
    %c0_i32 = arith.constant 0 : i32
    %c0_i32_0 = arith.constant 0 : i32
    return %arg0, %c0_i32 : i32, i32
  }
}

module attributes {stable_mosaic.version = 11 : i64} {
  func.func @_cross_attention_kernel(%arg0: i32, %arg1: memref<2x8x32xf32, #tpu.memory_space<vmem>>, %arg2: memref<2x8x32xf32, #tpu.memory_space<vmem>>, %arg3: memref<2x8x32xf32, #tpu.memory_space<vmem>>, %arg4: memref<64x32xf32, #tpu.memory_space<vmem>>, %arg5: memref<8x32xf32, #tpu.memory_space<vmem>>, %arg6: memref<32x32xf32, #tpu.memory_space<vmem>>, %arg7: memref<1x32xf32, #tpu.memory_space<vmem>>, %arg8: memref<32x32xf32, #tpu.memory_space<vmem>>, %arg9: memref<1x32xf32, #tpu.memory_space<vmem>>, %arg10: memref<32x32xf32, #tpu.memory_space<vmem>>, %arg11: memref<1x32xf32, #tpu.memory_space<vmem>>, %arg12: memref<32x32xf32, #tpu.memory_space<vmem>>, %arg13: memref<1x32xf32, #tpu.memory_space<vmem>>, %arg14: memref<2x32xf32, #tpu.memory_space<vmem>>) attributes {dimension_semantics = [#tpu.dimension_semantics<parallel>], iteration_bounds = array<i64: 1>, scalar_prefetch = 0 : i64, scratch_operands = 0 : i64, tpu.core_type = #tpu.core_type<tc>, window_params = [{transform_indices = @transform_0, window_bounds = array<i64: 2, 8, 32>}, {transform_indices = @transform_1, window_bounds = array<i64: 2, 8, 32>}, {transform_indices = @transform_2, window_bounds = array<i64: 2, 8, 32>}, {pipeline_mode = #tpu.pipeline_mode<synchronous>, transform_indices = @transform_3, window_bounds = array<i64: 64, 32>}, {pipeline_mode = #tpu.pipeline_mode<synchronous>, transform_indices = @transform_4, window_bounds = array<i64: 8, 32>}, {pipeline_mode = #tpu.pipeline_mode<synchronous>, transform_indices = @transform_5, window_bounds = array<i64: 32, 32>}, {pipeline_mode = #tpu.pipeline_mode<synchronous>, transform_indices = @transform_6, window_bounds = array<i64: 1, 32>}, {pipeline_mode = #tpu.pipeline_mode<synchronous>, transform_indices = @transform_7, window_bounds = array<i64: 32, 32>}, {pipeline_mode = #tpu.pipeline_mode<synchronous>, transform_indices = @transform_8, window_bounds = array<i64: 1, 32>}, {pipeline_mode = #tpu.pipeline_mode<synchronous>, transform_indices = @transform_9, window_bounds = array<i64: 32, 32>}, {pipeline_mode = #tpu.pipeline_mode<synchronous>, transform_indices = @transform_10, window_bounds = array<i64: 1, 32>}, {pipeline_mode = #tpu.pipeline_mode<synchronous>, transform_indices = @transform_11, window_bounds = array<i64: 32, 32>}, {pipeline_mode = #tpu.pipeline_mode<synchronous>, transform_indices = @transform_12, window_bounds = array<i64: 1, 32>}, {transform_indices = @transform_13, window_bounds = array<i64: 2, 32>}]} {
    %c0 = arith.constant 0 : index
    %c0_0 = arith.constant 0 : index
    %c0_1 = arith.constant 0 : index
    %0 = vector.load %arg1[%c0, %c0_0, %c0_1] : memref<2x8x32xf32, #tpu.memory_space<vmem>>, vector<2x8x32xf32>
    %1 = vector.shape_cast %0 : vector<2x8x32xf32> to vector<16x32xf32>
    %c0_2 = arith.constant 0 : index
    %c0_3 = arith.constant 0 : index
    %c0_4 = arith.constant 0 : index
    %2 = vector.load %arg2[%c0_2, %c0_3, %c0_4] : memref<2x8x32xf32, #tpu.memory_space<vmem>>, vector<2x8x32xf32>
    %3 = vector.shape_cast %2 : vector<2x8x32xf32> to vector<16x32xf32>
    %c0_5 = arith.constant 0 : index
    %c0_6 = arith.constant 0 : index
    %c0_7 = arith.constant 0 : index
    %4 = vector.load %arg3[%c0_5, %c0_6, %c0_7] : memref<2x8x32xf32, #tpu.memory_space<vmem>>, vector<2x8x32xf32>
    %5 = vector.shape_cast %4 : vector<2x8x32xf32> to vector<16x32xf32>
    %c0_8 = arith.constant 0 : index
    %c0_9 = arith.constant 0 : index
    %6 = vector.load %arg6[%c0_8, %c0_9] : memref<32x32xf32, #tpu.memory_space<vmem>>, vector<32x32xf32>
    %cst = arith.constant dense<0.000000e+00> : vector<16x32xf32>
    %7 = tpu.matmul %1, %6, %cst {dimension_numbers = #tpu.dot_dimension_numbers<[1], [0], [0], [1], [0, 0, 1, 1], [], []>} : vector<16x32xf32>, vector<32x32xf32>, vector<16x32xf32> -> vector<16x32xf32>
    %c0_10 = arith.constant 0 : index
    %c0_11 = arith.constant 0 : index
    %8 = vector.load %arg7[%c0_10, %c0_11] : memref<1x32xf32, #tpu.memory_space<vmem>>, vector<1x32xf32>
    %9 = vector.broadcast %8 : vector<1x32xf32> to vector<16x32xf32>
    %10 = arith.addf %7, %9 : vector<16x32xf32>
    %cst_12 = arith.constant 5.000000e-01 : f32
    %11 = vector.broadcast %cst_12 : f32 to vector<16x32xf32>
    %12 = arith.mulf %10, %11 : vector<16x32xf32>
    %c0_13 = arith.constant 0 : index
    %c0_14 = arith.constant 0 : index
    %13 = vector.load %arg8[%c0_13, %c0_14] : memref<32x32xf32, #tpu.memory_space<vmem>>, vector<32x32xf32>
    %cst_15 = arith.constant dense<0.000000e+00> : vector<16x32xf32>
    %14 = tpu.matmul %3, %13, %cst_15 {dimension_numbers = #tpu.dot_dimension_numbers<[1], [0], [0], [1], [0, 0, 1, 1], [], []>} : vector<16x32xf32>, vector<32x32xf32>, vector<16x32xf32> -> vector<16x32xf32>
    %c0_16 = arith.constant 0 : index
    %c0_17 = arith.constant 0 : index
    %15 = vector.load %arg9[%c0_16, %c0_17] : memref<1x32xf32, #tpu.memory_space<vmem>>, vector<1x32xf32>
    %16 = vector.broadcast %15 : vector<1x32xf32> to vector<16x32xf32>
    %17 = arith.addf %14, %16 : vector<16x32xf32>
    %c0_18 = arith.constant 0 : index
    %c0_19 = arith.constant 0 : index
    %18 = vector.load %arg10[%c0_18, %c0_19] : memref<32x32xf32, #tpu.memory_space<vmem>>, vector<32x32xf32>
    %cst_20 = arith.constant dense<0.000000e+00> : vector<16x32xf32>
    %19 = tpu.matmul %5, %18, %cst_20 {dimension_numbers = #tpu.dot_dimension_numbers<[1], [0], [0], [1], [0, 0, 1, 1], [], []>} : vector<16x32xf32>, vector<32x32xf32>, vector<16x32xf32> -> vector<16x32xf32>
    %c0_21 = arith.constant 0 : index
    %c0_22 = arith.constant 0 : index
    %20 = vector.load %arg11[%c0_21, %c0_22] : memref<1x32xf32, #tpu.memory_space<vmem>>, vector<1x32xf32>
    %21 = vector.broadcast %20 : vector<1x32xf32> to vector<16x32xf32>
    %22 = arith.addf %19, %21 : vector<16x32xf32>
    %23 = vector.shape_cast %12 : vector<16x32xf32> to vector<2x8x32xf32>
    %24 = vector.shape_cast %17 : vector<16x32xf32> to vector<2x8x32xf32>
    %25 = vector.shape_cast %22 : vector<16x32xf32> to vector<2x8x32xf32>
    %26 = tpu.concatenate %23, %23, %23, %23, %23, %23, %23, %23 in 1 : vector<2x8x32xf32>, vector<2x8x32xf32>, vector<2x8x32xf32>, vector<2x8x32xf32>, vector<2x8x32xf32>, vector<2x8x32xf32>, vector<2x8x32xf32>, vector<2x8x32xf32> -> vector<2x64x32xf32>
    %c0_23 = arith.constant 0 : index
    %c0_24 = arith.constant 0 : index
    %27 = vector.load %arg4[%c0_23, %c0_24] : memref<64x32xf32, #tpu.memory_space<vmem>>, vector<64x32xf32>
    %28 = vector.shape_cast %27 : vector<64x32xf32> to vector<1x64x32xf32>
    %29 = vector.broadcast %28 : vector<1x64x32xf32> to vector<2x64x32xf32>
    %30 = arith.mulf %26, %29 : vector<2x64x32xf32>
    "tpu.trace_start"() <{level = 10 : i32, message = "bmd,bkd->bmk"}> : () -> ()
    %cst_25 = arith.constant dense<0.000000e+00> : vector<2x64x8xf32>
    %31 = tpu.matmul %30, %24, %cst_25 {dimension_numbers = #tpu.dot_dimension_numbers<[2], [2], [1], [1], [0, 0, 0, 1, 1, 1], [0], [0]>} : vector<2x64x32xf32>, vector<2x8x32xf32>, vector<2x64x8xf32> -> vector<2x64x8xf32>
    "tpu.trace_stop"() : () -> ()
    %cst_26 = arith.constant dense<0xFF800000> : vector<2x64xf32>
    %32 = vector.multi_reduction <maximumf>, %31, %cst_26 [2] : vector<2x64x8xf32> to vector<2x64xf32>
    %33 = vector.shape_cast %32 : vector<2x64xf32> to vector<2x64x1xf32>
    %34 = vector.broadcast %33 : vector<2x64x1xf32> to vector<2x64x8xf32>
    %35 = arith.subf %31, %34 : vector<2x64x8xf32>
    %36 = math.exp %35 : vector<2x64x8xf32>
    %cst_27 = arith.constant dense<0.000000e+00> : vector<2x64xf32>
    %37 = vector.multi_reduction <add>, %36, %cst_27 [2] : vector<2x64x8xf32> to vector<2x64xf32>
    %38 = vector.shape_cast %37 : vector<2x64xf32> to vector<2x64x1xf32>
    %39 = tpu.reciprocal %38 {approx = true} : vector<2x64x1xf32> -> vector<2x64x1xf32>
    %40 = arith.mulf %38, %39 : vector<2x64x1xf32>
    %cst_28 = arith.constant 2.000000e+00 : f32
    %41 = vector.broadcast %cst_28 : f32 to vector<2x64x1xf32>
    %42 = arith.subf %41, %40 : vector<2x64x1xf32>
    %43 = arith.mulf %39, %42 : vector<2x64x1xf32>
    %cst_29 = arith.constant 1.250000e-01 : f32
    %44 = vector.broadcast %cst_29 : f32 to vector<2x64x1xf32>
    %45 = arith.mulf %43, %44 : vector<2x64x1xf32>
    %46 = vector.broadcast %45 : vector<2x64x1xf32> to vector<2x64x8xf32>
    %47 = arith.mulf %36, %46 : vector<2x64x8xf32>
    %48 = vector.shape_cast %47 : vector<2x64x8xf32> to vector<2x8x8x8xf32>
    %cst_30 = arith.constant dense<0.000000e+00> : vector<2x8x8xf32>
    %49 = vector.multi_reduction <add>, %48, %cst_30 [2] : vector<2x8x8x8xf32> to vector<2x8x8xf32>
    "tpu.trace_start"() <{level = 10 : i32, message = "bhk,bkd->bhd"}> : () -> ()
    %cst_31 = arith.constant dense<0.000000e+00> : vector<2x8x32xf32>
    %50 = tpu.matmul %49, %25, %cst_31 {dimension_numbers = #tpu.dot_dimension_numbers<[2], [1], [1], [2], [0, 0, 0, 1, 1, 2], [0], [0]>} : vector<2x8x8xf32>, vector<2x8x32xf32>, vector<2x8x32xf32> -> vector<2x8x32xf32>
    "tpu.trace_stop"() : () -> ()
    %c0_32 = arith.constant 0 : index
    %c0_33 = arith.constant 0 : index
    %51 = vector.load %arg5[%c0_32, %c0_33] : memref<8x32xf32, #tpu.memory_space<vmem>>, vector<8x32xf32>
    %52 = vector.shape_cast %51 : vector<8x32xf32> to vector<1x8x32xf32>
    %53 = vector.broadcast %52 : vector<1x8x32xf32> to vector<2x8x32xf32>
    %54 = arith.mulf %50, %53 : vector<2x8x32xf32>
    %cst_34 = arith.constant dense<0.000000e+00> : vector<2x32xf32>
    %55 = vector.multi_reduction <add>, %54, %cst_34 [1] : vector<2x8x32xf32> to vector<2x32xf32>
    %c0_35 = arith.constant 0 : index
    %c0_36 = arith.constant 0 : index
    %56 = vector.load %arg12[%c0_35, %c0_36] : memref<32x32xf32, #tpu.memory_space<vmem>>, vector<32x32xf32>
    %cst_37 = arith.constant dense<0.000000e+00> : vector<2x32xf32>
    %57 = tpu.matmul %55, %56, %cst_37 {dimension_numbers = #tpu.dot_dimension_numbers<[1], [0], [0], [1], [0, 0, 1, 1], [], []>} : vector<2x32xf32>, vector<32x32xf32>, vector<2x32xf32> -> vector<2x32xf32>
    %c0_38 = arith.constant 0 : index
    %c0_39 = arith.constant 0 : index
    %58 = vector.load %arg13[%c0_38, %c0_39] : memref<1x32xf32, #tpu.memory_space<vmem>>, vector<1x32xf32>
    %59 = vector.broadcast %58 : vector<1x32xf32> to vector<2x32xf32>
    %60 = arith.addf %57, %59 : vector<2x32xf32>
    %c0_40 = arith.constant 0 : index
    %c0_41 = arith.constant 0 : index
    %61 = vector.load %arg14[%c0_40, %c0_41] : memref<2x32xf32, #tpu.memory_space<vmem>>, vector<2x32xf32>
    tpu.vector_store %arg14[%c0_40, %c0_41], %60 {strides = array<i32>} : memref<2x32xf32, #tpu.memory_space<vmem>>, vector<2x32xf32>,
    return
  }
  func.func @transform_0(%arg0: i32) -> (i32, i32, i32) {
    %c0_i32 = arith.constant 0 : i32
    %c0_i32_0 = arith.constant 0 : i32
    %c0_i32_1 = arith.constant 0 : i32
    return %arg0, %c0_i32, %c0_i32_0 : i32, i32, i32
  }
  func.func @transform_1(%arg0: i32) -> (i32, i32, i32) {
    %c0_i32 = arith.constant 0 : i32
    %c0_i32_0 = arith.constant 0 : i32
    %c0_i32_1 = arith.constant 0 : i32
    return %arg0, %c0_i32, %c0_i32_0 : i32, i32, i32
  }
  func.func @transform_2(%arg0: i32) -> (i32, i32, i32) {
    %c0_i32 = arith.constant 0 : i32
    %c0_i32_0 = arith.constant 0 : i32
    %c0_i32_1 = arith.constant 0 : i32
    return %arg0, %c0_i32, %c0_i32_0 : i32, i32, i32
  }
  func.func @transform_3(%arg0: i32) -> (i32, i32) {
    %c0_i32 = arith.constant 0 : i32
    %c0_i32_0 = arith.constant 0 : i32
    %c0_i32_1 = arith.constant 0 : i32
    return %c0_i32, %c0_i32_0 : i32, i32
  }
  func.func @transform_4(%arg0: i32) -> (i32, i32) {
    %c0_i32 = arith.constant 0 : i32
    %c0_i32_0 = arith.constant 0 : i32
    %c0_i32_1 = arith.constant 0 : i32
    return %c0_i32, %c0_i32_0 : i32, i32
  }
  func.func @transform_5(%arg0: i32) -> (i32, i32) {
    %c0_i32 = arith.constant 0 : i32
    %c0_i32_0 = arith.constant 0 : i32
    %c0_i32_1 = arith.constant 0 : i32
    return %c0_i32, %c0_i32_0 : i32, i32
  }
  func.func @transform_6(%arg0: i32) -> (i32, i32) {
    %c0_i32 = arith.constant 0 : i32
    %c0_i32_0 = arith.constant 0 : i32
    %c0_i32_1 = arith.constant 0 : i32
    return %c0_i32, %c0_i32_0 : i32, i32
  }
  func.func @transform_7(%arg0: i32) -> (i32, i32) {
    %c0_i32 = arith.constant 0 : i32
    %c0_i32_0 = arith.constant 0 : i32
    %c0_i32_1 = arith.constant 0 : i32
    return %c0_i32, %c0_i32_0 : i32, i32
  }
  func.func @transform_8(%arg0: i32) -> (i32, i32) {
    %c0_i32 = arith.constant 0 : i32
    %c0_i32_0 = arith.constant 0 : i32
    %c0_i32_1 = arith.constant 0 : i32
    return %c0_i32, %c0_i32_0 : i32, i32
  }
  func.func @transform_9(%arg0: i32) -> (i32, i32) {
    %c0_i32 = arith.constant 0 : i32
    %c0_i32_0 = arith.constant 0 : i32
    %c0_i32_1 = arith.constant 0 : i32
    return %c0_i32, %c0_i32_0 : i32, i32
  }
  func.func @transform_10(%arg0: i32) -> (i32, i32) {
    %c0_i32 = arith.constant 0 : i32
    %c0_i32_0 = arith.constant 0 : i32
    %c0_i32_1 = arith.constant 0 : i32
    return %c0_i32, %c0_i32_0 : i32, i32
  }
  func.func @transform_11(%arg0: i32) -> (i32, i32) {
    %c0_i32 = arith.constant 0 : i32
    %c0_i32_0 = arith.constant 0 : i32
    %c0_i32_1 = arith.constant 0 : i32
    return %c0_i32, %c0_i32_0 : i32, i32
  }
  func.func @transform_12(%arg0: i32) -> (i32, i32) {
    %c0_i32 = arith.constant 0 : i32
    %c0_i32_0 = arith.constant 0 : i32
    %c0_i32_1 = arith.constant 0 : i32
    return %c0_i32, %c0_i32_0 : i32, i32
  }
  func.func @transform_13(%arg0: i32) -> (i32, i32) {
    %c0_i32 = arith.constant 0 : i32
    %c0_i32_0 = arith.constant 0 : i32
    return %arg0, %c0_i32 : i32, i32
  }
}

</mosaic_0001>

<bundles_post_ra>
// kernel: tpu_custom_call.1
= control target key start
LH: loop header
LB: loop body
LE: loop exit
PB: predicated region body
PF: predicated region fallthrough
CT: control target
= control target key end

     0   :  { %18 = vsyncpa [#allocation3], 0  ;;  %s2179_s0 = inlined_call_operand.hbm [shape: f32[2,8,32], index: 0, kind: input, shape index: {}]   ;;  %s2180_s1 = inlined_call_operand.hbm [shape: f32[2,8,32], index: 1, kind: input, shape index: {}]   ;;  %s2181_s2 = inlined_call_operand.hbm [shape: f32[2,8,32], index: 2, kind: input, shape index: {}]   ;;  %s2182_s3 = inlined_call_operand.vmem [shape: f32[64,32], index: 3, kind: input, shape index: {}]   ;;  %s2183_s4 = inlined_call_operand.hbm [shape: f32[8,32], index: 4, kind: input, shape index: {}]   ;;  %s2184_s5 = inlined_call_operand.vmem [shape: f32[32,32], index: 5, kind: input, shape index: {}]   ;;  %s2185_s6 = inlined_call_operand.vmem [shape: f32[1,32], index: 6, kind: input, shape index: {}]   ;;  %s2186_s7 = inlined_call_operand.vmem [shape: f32[32,32], index: 7, kind: input, shape index: {}]   ;;  %s2187_s8 = inlined_call_operand.vmem [shape: f32[1,32], index: 8, kind: input, shape index: {}]   ;;  %s2188_s9 = inlined_call_operand.vmem [shape: f32[32,32], index: 9, kind: input, shape index: {}]   ;;  %s2189_s10 = inlined_call_operand.vmem [shape: f32[1,32], index: 10, kind: input, shape index: {}]   ;;  %s2190_s11 = inlined_call_operand.vmem [shape: f32[32,32], index: 11, kind: input, shape index: {}]   ;;  %s2191_s12 = inlined_call_operand.vmem [shape: f32[1,32], index: 12, kind: input, shape index: {}]   ;;  %s2192_s13 = inlined_call_operand.hbm [shape: f32[2,32], index: 13, kind: output, shape index: {}]  }
   0x1   :  { %19 = vsyncpa [#allocation6], 0 }
   0x2   :  { %20 = vsyncpa [#allocation9], 0 }
   0x3   :  { %21 = vsyncpa [#allocation4], 0  ;;  %s1707_s25 = smov [#allocation5]   ;;  %s1708_s27 = smov [#allocation2]  }
   0x4   :  { %s39_s26 = sshll.u32 %s1707_s25, 4  ;;  %s27_s28 = sshll.u32 %s1708_s27, 4  ;;  %s40_s26 = int_to_ptr.vmem [resolvable:$true] %s39_s26  ;;  %s1787_s28 = int_to_ptr.vmem [resolvable:$true] %s27_s28 }
   0x5   :  { %s1589_s14 = scalar_lea.hbm %s2180_s1, 256 }
   0x6   :  { %p1590_p0 = scmp.ne.s32.totalorder %s2180_s1, %s1589_s14  ;;  %p1593_p1 = scmp.lt.u32.totalorder %s1589_s14, %s2180_s1 }
   0x8   :  { %p1595_p2 = pnand %p1593_p1, %p1590_p0 }
   0xa   :  { %1598 = shalt.err (!%p1595_p2)
}
   0xb   :  { %s1599_s19 = scalar_lea.vmem %s40_s26, 256  ;;  %p1604_p4 = scmp.lt.s32.totalorder %s40_s26, %s40_s26 }
   0xc   :  { %p1600_p3 = scmp.ne.s32.totalorder %s40_s26, %s1599_s19  ;;  %p1605_p5 = scmp.lt.s32.totalorder %s1599_s19, %s1599_s19 }
   0xe   :  { %p1606_p6 = por %p1605_p5, %p1604_p4 }
  0x10   :  { %p1607_p7 = pnand %p1606_p6, %p1600_p3 }
  0x12   :  { %1610 = shalt.err (!%p1607_p7)
}
  0x13   :  { %s1709_s20 = smov 128   ;;  %s1710_s21 = smov 8  }
  0x14   :  { %45 = dma.hbm_to_vmem [thread:$0]  %s2180_s1, 256, %s40_s26, [#allocation6], %s1709_s20, %s1709_s20, %s1710_s21  }
  0x15   :  { %s1611_s27 = scalar_lea.hbm %s2179_s0, 256 }
  0x16   :  { %p1612_p8 = scmp.ne.s32.totalorder %s2179_s0, %s1611_s27  ;;  %p1615_p9 = scmp.lt.u32.totalorder %s1611_s27, %s2179_s0 }
  0x18   :  { %p1617_p10 = pnand %p1615_p9, %p1612_p8 }
  0x1a   :  { %1620 = shalt.err (!%p1617_p10)
}
  0x1b   :  { %s1621_s16 = scalar_lea.vmem %s1787_s28, 256  ;;  %p1626_p12 = scmp.lt.s32.totalorder %s1787_s28, %s1787_s28 }
  0x1c   :  { %p1622_p11 = scmp.ne.s32.totalorder %s1787_s28, %s1621_s16  ;;  %p1627_p13 = scmp.lt.s32.totalorder %s1621_s16, %s1621_s16 }
  0x1e   :  { %p1628_p0 = por %p1627_p13, %p1626_p12 }
  0x20   :  { %p1629_p1 = pnand %p1628_p0, %p1622_p11 }
  0x22   :  { %1632 = shalt.err (!%p1629_p1)
}
  0x23   :  { %33 = dma.hbm_to_vmem [thread:$0]  %s2179_s0, 256, %s1787_s28, [#allocation3], %s1709_s20, %s1709_s20, %s1710_s21  }
  0x24   :  { %s1711_s17 = smov [#allocation7]   ;;  %s1712_s19 = smov [#allocation8]  }
  0x25   :  { %s51_s18 = sshll.u32 %s1711_s17, 4  ;;  %s66_s22 = sshll.u32 %s1712_s19, 4  ;;  %s52_s18 = int_to_ptr.vmem [resolvable:$true] %s51_s18  ;;  %s67_s22 = int_to_ptr.vmem [resolvable:$true] %s66_s22 }
  0x26   :  { %s1633_s25 = scalar_lea.hbm %s2181_s2, 256 }
  0x27   :  { %p1634_p2 = scmp.ne.s32.totalorder %s2181_s2, %s1633_s25  ;;  %p1637_p3 = scmp.lt.u32.totalorder %s1633_s25, %s2181_s2 }
  0x29   :  { %p1639_p4 = pnand %p1637_p3, %p1634_p2 }
  0x2b   :  { %1642 = shalt.err (!%p1639_p4)
}
  0x2c   :  { %s1643_s0 = scalar_lea.vmem %s52_s18, 256  ;;  %p1648_p6 = scmp.lt.s32.totalorder %s52_s18, %s52_s18 }
  0x2d   :  { %p1644_p5 = scmp.ne.s32.totalorder %s52_s18, %s1643_s0  ;;  %p1649_p7 = scmp.lt.s32.totalorder %s1643_s0, %s1643_s0 }
  0x2f   :  { %p1650_p8 = por %p1649_p7, %p1648_p6 }
  0x31   :  { %p1651_p9 = pnand %p1650_p8, %p1644_p5 }
  0x33   :  { %1654 = shalt.err (!%p1651_p9)
}
  0x34   :  { %57 = dma.hbm_to_vmem [thread:$0]  %s2181_s2, 256, %s52_s18, [#allocation6], %s1709_s20, %s1709_s20, %s1710_s21  }
  0x35   :  { %s1655_s26 = scalar_lea.hbm %s2183_s4, 128 }
  0x36   :  { %p1656_p10 = scmp.ne.s32.totalorder %s2183_s4, %s1655_s26  ;;  %p1659_p11 = scmp.lt.u32.totalorder %s1655_s26, %s2183_s4 }
  0x38   :  { %p1661_p12 = pnand %p1659_p11, %p1656_p10 }
  0x3a   :  { %1664 = shalt.err (!%p1661_p12)
}
  0x3b   :  { %s1665_s25 = scalar_lea.vmem %s67_s22, 128  ;;  %p1670_p0 = scmp.lt.s32.totalorder %s67_s22, %s67_s22 }
  0x3c   :  { %p1666_p13 = scmp.ne.s32.totalorder %s67_s22, %s1665_s25  ;;  %p1671_p1 = scmp.lt.s32.totalorder %s1665_s25, %s1665_s25 }
  0x3e   :  { %p1672_p2 = por %p1671_p1, %p1670_p0 }
  0x40   :  { %p1673_p3 = pnand %p1672_p2, %p1666_p13 }
  0x42   :  { %1676 = shalt.err (!%p1673_p3)
}
  0x43   :  { %69 = dma.hbm_to_vmem [thread:$0]  %s2183_s4, 128, %s67_s22, [#allocation9]  }
  0x44   :  { %1699 = dma.done.wait [#allocation3], 256  }
  0x45   :  { %1700 = vsyncadd [#allocation3], 4294967040 }
  0x46   :  { %1701 = dma.done.wait [#allocation6], 512  }
  0x47   :  { %1702 = vsyncadd [#allocation6], 4294966784 }
  0x48   :  { %1703 = dma.done.wait [#allocation9], 128  }
  0x49   :  { %1704 = vsyncadd [#allocation9], 4294967168  ;;  %v104_v0 = vld [vmem:[%s2184_s5] sm:$0xff]  ;;  %v105_v1 = vld [vmem:[%s2184_s5 + $0x8] sm:$0xff]  ;;  %vm115_vm0 = vcmask 261120   ;;  %v1713_v48 = vmov 0.0  }
  0x4a   :  { %v199_v2 = vld [vmem:[%s2186_s7] sm:$0xff]  ;;  %v1485_v3 = vpack.c.bf16 %v105_v1, %v104_v0  ;;  %v200_v4 = vld [vmem:[%s2186_s7 + $0x8] sm:$0xff]  ;;  %v106_v5 = vld [vmem:[%s2184_s5 + $0x10] sm:$0xff]  ;;  %vm671_vm1 = vcmask 64512   ;;  %vm1714_vm2 = vmmov 0   ;;  %vm1034_vm3 = vcmask 1042434  }
  0x4b   :  { %v107_v6 = vld [vmem:[%s2184_s5 + $0x18] sm:$0xff]  ;;  %v1493_v7 = vpack.c.bf16 %v200_v4, %v199_v2  ;;  %v201_v9 = vld [vmem:[%s2186_s7 + $0x10] sm:$0xff]  ;;  %v98_v11 = vld [vmem:[#allocation2] sm:$0xff]  ;;  %vm1032_vm4 = vcmask 1041409   ;;  %vm1036_vm5 = vcmask 1043459   ;;  %vm1038_vm6 = vcmask 1044484  }
  0x4c   :  { %v1489_v8 = vpack.c.bf16 %v107_v6, %v106_v5  ;;  %v202_v10 = vld [vmem:[%s2186_s7 + $0x18] sm:$0xff]  ;;  %1486 = vmatprep.subr.bf16.mxu0 %v1485_v3  ;;  %1411 = vmatprep.mubr.msk.f32.mxu0 %vm115_vm0, %v98_v11  ;;  %v100_v13 = vld [vmem:[#allocation5] sm:$0xff]  ;;  %v291_v14 = vld [vmem:[%s2188_s9] sm:$0xff]  ;;  %vm1040_vm7 = vcmask 1045509   ;;  %vm1042_vm8 = vcmask 1046534   ;;  %vm1044_vm9 = vcmask 1047559  }
  0x4d   :  { %v1497_v12 = vpack.c.bf16 %v202_v10, %v201_v9  ;;  %1494 = vmatprep.subr.bf16.mxu1 %v1493_v7  ;;  %1488 = vmatpush3.bf16.msra.mxu0 %v1485_v3  ;;  %v292_v15 = vld [vmem:[%s2188_s9 + $0x8] sm:$0xff]  ;;  %v293_v17 = vld [vmem:[%s2188_s9 + $0x10] sm:$0xff]  ;;  %v294_v18 = vld [vmem:[%s2188_s9 + $0x18] sm:$0xff]  ;;  %s1716_s29 = smov [#allocation10]   ;;  %vm1308_vm10 = vcmask 254976  }
  0x4e   :  { %1496 = vmatpush3.bf16.msra.mxu1 %v1493_v7  ;;  %1490 = vmatprep.subr.bf16.mxu0 %v1489_v8  ;;  %v1501_v16 = vpack.c.bf16 %v292_v15, %v291_v14  ;;  %v99_v19 = vld [vmem:[#allocation2 + $0x8] sm:$0xff]  ;;  %v101_v20 = vld [vmem:[#allocation5 + $0x8] sm:$0xff]  ;;  %v1505_v21 = vpack.c.bf16 %v294_v18, %v293_v17  ;;  %v102_v22 = vld [vmem:[#allocation7] sm:$0xff]  ;;  %s1316_s30 = sshll.u32 %s1716_s29, 4  ;;  %s1317_s30 = int_to_ptr.vmem [resolvable:$true] %s1316_s30 }
  0x4f   :  { %1498 = vmatprep.subr.bf16.mxu1 %v1497_v12  ;;  %1422 = vmatprep.mubr.msk.f32.mxu1 %vm115_vm0, %v100_v13  ;;  %v103_v23 = vld [vmem:[#allocation7 + $0x8] sm:$0xff]  ;;  %v1327_v24 = vld [vmem:[%s2185_s6] ss:$0 sm:$0xff]  ;;  %v385_v38 = vld [vmem:[%s2182_s3 + $0x10] sm:$0xff]  ;;  %s1677_s14 = scalar_lea.vmem %s1317_s30, 32  ;;  %p1682_p5 = scmp.lt.s32.totalorder %s1317_s30, %s1317_s30 }
  0x50   :  { %v1330_v25 = vld [vmem:[%s2187_s8] ss:$0 sm:$0xff]  ;;  %v384_v34 = vld [vmem:[%s2182_s3 + $0x8] sm:$0xff]  ;;  %v386_v44 = vld [vmem:[%s2182_s3 + $0x18] sm:$0xff]  ;;  %p1678_p4 = scmp.ne.s32.totalorder %s1317_s30, %s1677_s14  ;;  %p1683_p6 = scmp.lt.s32.totalorder %s1677_s14, %s1677_s14 }
  0x51   :  { %1492 = vmatpush3.bf16.msra.mxu0 %v1489_v8  ;;  %v383_v33 = vld [vmem:[%s2182_s3] sm:$0xff]  ;;  %v388_v51 = vld [vmem:[%s2182_s3 + $0x28] sm:$0xff]  ;;  %v389_v53 = vld [vmem:[%s2182_s3 + $0x30] sm:$0xff] }
  0x52   :  { %1500 = vmatpush3.bf16.msra.mxu1 %v1497_v12  ;;  %1502 = vmatprep.subr.bf16.mxu0 %v1501_v16  ;;  %v387_v46 = vld [vmem:[%s2182_s3 + $0x20] sm:$0xff]  ;;  %v390_v57 = vld [vmem:[%s2182_s3 + $0x38] sm:$0xff]  ;;  %p1684_p7 = por %p1683_p6, %p1682_p5 }
  0x53   :  { %v1333_v61 = vld [vmem:[%s2189_s10] ss:$0 sm:$0xff] }
  0x54   :  { %1412 = vmatmul.mubr.msk.f32.vlgmr.msra.gmra.mrb[0].mxu0 %vm115_vm0, %v99_v19  ;;  %p1685_p8 = pnand %p1684_p7, %p1678_p4 }
  0x55   :  { %1423 = vmatmul.mubr.msk.f32.vlgmr.msra.gmra.mrb[0].mxu1 %vm115_vm0, %v101_v20  ;;  %1504 = vmatpush3.bf16.msra.mxu0 %v1501_v16 }
  0x56   :  { %1506 = vmatprep.subr.bf16.mxu0 %v1505_v21  ;;  %1433 = vmatprep.mubr.msk.f32.mxu0 %vm115_vm0, %v102_v22 }
  0x59   :  { %1508 = vmatpush3.bf16.msra.mxu0 %v1505_v21 }
  0x5c   :  { %1434 = vmatmul.mubr.msk.f32.vlgmr.msra.gmra.mrb[2].mxu0 %vm115_vm0, %v103_v23 }
 0x127   :  { %v1413_v26 = vpop.f32.mrb[0].mxu0 }
 0x128   :  { %v194_v27 = vadd.f32 %v1413_v26, %v1327_v24  ;;  %v1424_v28 = vpop.f32.mrb[0].mxu1  ;;  %v188_v29 = vpop.f32.mrb[1].mxu0 }
 0x129   :  { %v288_v30 = vadd.f32 %v1424_v28, %v1330_v25  ;;  %v189_v31 = vadd.f32 %v1327_v24, %v188_v29  ;;  %v282_v32 = vpop.f32.mrb[1].mxu1 }
 0x12a   :  { %v198_v35 = vmul.f32 0.5, %v194_v27  ;;  %v283_v36 = vadd.f32 %v1330_v25, %v282_v32 }
 0x12b   :  { %v197_v37 = vmul.f32 0.5, %v189_v31  ;;  %1450 = vmatprep.subr.msk.mxu0 %vm115_vm0, %v288_v30 }
 0x12c   :  { %1436 = vmatprep.subr.msk.mxu1 %vm115_vm0, %v283_v36  ;;  %1451 = vmatpush3.xpose.msk.msra.mxu0 %vm115_vm0, %v288_v30  ;;  %v399_v39 = vmul.f32 %v383_v33, %v198_v35  ;;  %v400_v40 = vmul.f32 %v384_v34, %v198_v35  ;;  %v401_v43 = vmul.f32 %v385_v38, %v198_v35 }
 0x12d   :  { %1437 = vmatpush3.xpose.msk.msra.mxu1 %vm115_vm0, %v283_v36  ;;  %v391_v41 = vmul.f32 %v383_v33, %v197_v37  ;;  %v392_v42 = vmul.f32 %v384_v34, %v197_v37  ;;  %v393_v45 = vmul.f32 %v385_v38, %v197_v37  ;;  %v402_v47 = vmul.f32 %v386_v44, %v198_v35 }
 0x12e   :  { %1452 = vmatprep.mubr.msk.f32.mxu0 %vm115_vm0, %v399_v39  ;;  %1464 = vmatprep.subr.mxu1 %v1713_v48  ;;  %v394_v49 = vmul.f32 %v386_v44, %v197_v37  ;;  %v403_v50 = vmul.f32 %v387_v46, %v198_v35  ;;  %v395_v52 = vmul.f32 %v387_v46, %v197_v37 }
 0x12f   :  { %1438 = vmatprep.mubr.msk.f32.mxu1 %vm115_vm0, %v391_v41  ;;  %1453 = vmatmul.mubr.msk.f32.vlgmr.msra.gmra.mrb[4].mxu0 %vm115_vm0, %v400_v40  ;;  %v404_v54 = vmul.f32 %v388_v51, %v198_v35  ;;  %v396_v55 = vmul.f32 %v388_v51, %v197_v37  ;;  %v405_v56 = vmul.f32 %v389_v53, %v198_v35  ;;  %v1435_v62 = vpop.f32.mrb[2].mxu0 }
 0x130   :  { %1439 = vmatmul.mubr.msk.f32.vlgmr.msra.gmra.mrb[2].mxu1 %vm115_vm0, %v392_v42  ;;  %1455 = vmatprep.mubr.msk.f32.mxu0 %vm115_vm0, %v401_v43  ;;  %v397_v58 = vmul.f32 %v389_v53, %v197_v37  ;;  %v406_v59 = vmul.f32 %v390_v57, %v198_v35  ;;  %v398_v60 = vmul.f32 %v390_v57, %v197_v37  ;;  %v374_v0 = vpop.f32.mrb[3].mxu0 }
 0x131   :  { %1441 = vmatprep.mubr.msk.f32.mxu1 %vm115_vm0, %v393_v45  ;;  %v1947_v63 = vadd.f32 %v1435_v62, %v1333_v61  ;;  %v375_v1 = vadd.f32 %v1333_v61, %v374_v0 }
 0x133   :  { %1456 = vmatmul.mubr.msk.f32.gmra.mrb[6].mxu0 %vm115_vm0, %v402_v47  ;;  %1465 = vmatpush3.msra.mxu1 %v375_v1 }
 0x134   :  { %1442 = vmatmul.mubr.msk.f32.gmra.mrb[4].mxu1 %vm115_vm0, %v394_v49  ;;  %1458 = vmatprep.mubr.msk.f32.mxu0 %vm115_vm0, %v403_v50 }
 0x135   :  { %1444 = vmatprep.mubr.msk.f32.mxu1 %vm115_vm0, %v395_v52  ;;  %1469 = vmatprep.subr.mxu1 %v1713_v48 }
 0x137   :  { %1459 = vmatmul.mubr.msk.f32.gmra.mrb[8].mxu0 %vm115_vm0, %v404_v54 }
 0x138   :  { %1445 = vmatmul.mubr.msk.f32.gmra.mrb[6].mxu1 %vm115_vm0, %v396_v55  ;;  %1461 = vmatprep.mubr.msk.f32.mxu0 %vm115_vm0, %v405_v56 }
 0x139   :  { %1447 = vmatprep.mubr.msk.f32.mxu1 %vm115_vm0, %v397_v58 }
 0x13b   :  { %1462 = vmatmul.mubr.msk.f32.gmra.mrb[10].mxu0 %vm115_vm0, %v406_v59 }
 0x13c   :  { %1448 = vmatmul.mubr.msk.f32.gmra.mrb[8].mxu1 %vm115_vm0, %v398_v60  ;;  %1482 = vmatprep.mubr.msk.f32.mxu0 %vm1714_vm2, %v1713_v48 }
 0x13d   :  { %1466 = vmatprep.mubr.msk.f32.mxu1 %vm1714_vm2, %v1713_v48 }
 0x202   :  { %v1454_v2 = vpop.f32.mrb[4].mxu0 }
 0x203   :  { %v1440_v3 = vpop.f32.mrb[2].mxu1  ;;  %v632_v4 = vpop.f32.mrb[5].mxu0  ;;  %v699_v5 = vsel %vm671_vm1, %v1454_v2, -inf }
 0x204   :  { %700 = vmax.xlane.f32.xlu1 %v699_v5  ;;  %v1951_v6 = vpop.f32.mrb[3].mxu1  ;;  %v675_v7 = vsel %vm671_vm1, %v1440_v3, -inf  ;;  %v696_v13 = vsel %vm671_vm1, %v632_v4, -inf }
 0x205   :  { %676 = vmax.xlane.f32.xlu0 %v675_v7  ;;  %v672_v19 = vsel %vm671_vm1, %v1951_v6, -inf }
 0x206   :  { %v1457_v8 = vpop.f32.mrb[6].mxu0 }
 0x207   :  { %v1443_v9 = vpop.f32.mrb[4].mxu1  ;;  %v1954_v10 = vpop.f32.mrb[7].mxu0  ;;  %v705_v11 = vsel %vm671_vm1, %v1457_v8, -inf }
 0x208   :  { %706 = vmax.xlane.f32.xlu1 %v705_v11  ;;  %v1957_v12 = vpop.f32.mrb[5].mxu1  ;;  %v681_v17 = vsel %vm671_vm1, %v1443_v9, -inf  ;;  %v702_v23 = vsel %vm671_vm1, %v1954_v10, -inf }
 0x209   :  { %697 = vmax.xlane.f32.xlu0 %v696_v13  ;;  %v678_v26 = vsel %vm671_vm1, %v1957_v12, -inf }
 0x20a   :  { %v1960_v14 = vpop.f32.mrb[8].mxu0 }
 0x20b   :  { %v1962_v15 = vpop.f32.mrb[6].mxu1  ;;  %v1964_v16 = vpop.f32.mrb[9].mxu0  ;;  %v711_v30 = vsel %vm671_vm1, %v1960_v14, -inf }
 0x20c   :  { %682 = vmax.xlane.f32.xlu1 %v681_v17  ;;  %v1967_v18 = vpop.f32.mrb[7].mxu1  ;;  %v708_v25 = vsel %vm671_vm1, %v1964_v16, -inf  ;;  %v687_v28 = vsel %vm671_vm1, %v1962_v15, -inf }
 0x20d   :  { %673 = vmax.xlane.f32.xlu0 %v672_v19  ;;  %v684_v27 = vsel %vm671_vm1, %v1967_v18, -inf }
 0x20e   :  { %v1971_v20 = vpop.f32.mrb[10].mxu0 }
 0x20f   :  { %v1973_v21 = vpop.f32.mrb[8].mxu1  ;;  %v1975_v22 = vpop.f32.mrb[11].mxu0  ;;  %v717_v32 = vsel %vm671_vm1, %v1971_v20, -inf }
 0x210   :  { %703 = vmax.xlane.f32.xlu1 %v702_v23  ;;  %v1979_v24 = vpop.f32.mrb[9].mxu1  ;;  %v693_v29 = vsel %vm671_vm1, %v1973_v21, -inf  ;;  %v714_v33 = vsel %vm671_vm1, %v1975_v22, -inf }
 0x211   :  { %709 = vmax.xlane.f32.xlu0 %v708_v25  ;;  %v690_v31 = vsel %vm671_vm1, %v1979_v24, -inf }
 0x214   :  { %679 = vmax.xlane.f32.xlu1 %v678_v26 }
 0x215   :  { %685 = vmax.xlane.f32.xlu0 %v684_v27 }
 0x218   :  { %688 = vmax.xlane.f32.xlu1 %v687_v28 }
 0x219   :  { %694 = vmax.xlane.f32.xlu0 %v693_v29 }
 0x21c   :  { %712 = vmax.xlane.f32.xlu1 %v711_v30 }
 0x21d   :  { %691 = vmax.xlane.f32.xlu0 %v690_v31 }
 0x220   :  { %718 = vmax.xlane.f32.xlu1 %v717_v32 }
 0x221   :  { %715 = vmax.xlane.f32.xlu0 %v714_v33 }
 0x291   :  { %v701_v34 = vpop.xlane.xlu1 %700 }
 0x292   :  { %v729_v35 = vsub.f32 %v1454_v2, %v701_v34  ;;  %v677_v36 = vpop.xlane.xlu0 %676 }
 0x293   :  { %v721_v37 = vsub.f32 %v1440_v3, %v677_v36 }
 0x294   :  { %v754_v38 = vmul.f32 1.442695, %v729_v35 }
 0x295   :  { %v738_v39 = vmul.f32 1.442695, %v721_v37  ;;  %v707_v40 = vpop.xlane.xlu1 %706 }
 0x296   :  { %1525 = vpow2.f32 %v754_v38  ;;  %v731_v41 = vsub.f32 %v1457_v8, %v707_v40  ;;  %v698_v42 = vpop.xlane.xlu0 %697 }
 0x297   :  { %v728_v43 = vsub.f32 %v632_v4, %v698_v42  ;;  %1527 = vpow2.f32 %v738_v39 }
 0x298   :  { %v758_v44 = vmul.f32 1.442695, %v731_v41 }
 0x299   :  { %v752_v45 = vmul.f32 1.442695, %v728_v43  ;;  %v683_v46 = vpop.xlane.xlu1 %682 }
 0x29a   :  { %v723_v47 = vsub.f32 %v1443_v9, %v683_v46  ;;  %v674_v49 = vpop.xlane.xlu0 %673 }
 0x29b   :  { %1529 = vpow2.f32 %v752_v45  ;;  %v720_v50 = vsub.f32 %v1951_v6, %v674_v49 }
 0x29c   :  { %1531 = vpow2.f32 %v758_v44  ;;  %v742_v51 = vmul.f32 1.442695, %v723_v47 }
 0x29d   :  { %v736_v52 = vmul.f32 1.442695, %v720_v50  ;;  %v704_v53 = vpop.xlane.xlu1 %703 }
 0x29e   :  { %v730_v54 = vsub.f32 %v1954_v10, %v704_v53  ;;  %v710_v55 = vpop.xlane.xlu0 %709 }
 0x29f   :  { %1533 = vpow2.f32 %v736_v52  ;;  %v732_v58 = vsub.f32 %v1964_v16, %v710_v55 }
 0x2a0   :  { %v2001_v56 = vpop.eup %1525  ;;  %1535 = vpow2.f32 %v742_v51  ;;  %v756_v57 = vmul.f32 1.442695, %v730_v54 }
 0x2a1   :  { %v680_v59 = vpop.xlane.xlu1 %679  ;;  %v795_v60 = vsel %vm671_vm1, %v2001_v56, 0.0  ;;  %v2006_v61 = vpop.eup %1527  ;;  %v760_v1 = vmul.f32 1.442695, %v732_v58 }
 0x2a2   :  { %v722_v62 = vsub.f32 %v1957_v12, %v680_v59  ;;  %796 = vadd.xlane.f32.xlu1 %v795_v60  ;;  %v686_v0 = vpop.xlane.xlu0 %685  ;;  %1537 = vpow2.f32 %v756_v57  ;;  %v771_v6 = vsel %vm671_vm1, %v2006_v61, 0.0 }
 0x2a3   :  { %v724_v3 = vsub.f32 %v1967_v18, %v686_v0 }
 0x2a4   :  { %v740_v2 = vmul.f32 1.442695, %v722_v62 }
 0x2a5   :  { %v2010_v4 = vpop.eup %1529  ;;  %v689_v5 = vpop.xlane.xlu1 %688  ;;  %v744_v11 = vmul.f32 1.442695, %v724_v3 }
 0x2a6   :  { %v2014_v7 = vpop.eup %1531  ;;  %1539 = vpow2.f32 %v740_v2  ;;  %v725_v8 = vsub.f32 %v1962_v15, %v689_v5  ;;  %772 = vadd.xlane.f32.xlu1 %v771_v6  ;;  %v695_v9 = vpop.xlane.xlu0 %694  ;;  %v792_v10 = vsel %vm671_vm1, %v2010_v4, 0.0 }
 0x2a7   :  { %793 = vadd.xlane.f32.xlu0 %v792_v10  ;;  %1541 = vpow2.f32 %v760_v1  ;;  %v727_v13 = vsub.f32 %v1973_v21, %v695_v9  ;;  %v801_v18 = vsel %vm671_vm1, %v2014_v7, 0.0 }
 0x2a8   :  { %v746_v12 = vmul.f32 1.442695, %v725_v8 }
 0x2a9   :  { %v2020_v16 = vpop.eup %1533  ;;  %v713_v17 = vpop.xlane.xlu1 %712  ;;  %v750_v26 = vmul.f32 1.442695, %v727_v13 }
 0x2aa   :  { %v2024_v19 = vpop.eup %1535  ;;  %1543 = vpow2.f32 %v746_v12  ;;  %v733_v15 = vsub.f32 %v1960_v14, %v713_v17  ;;  %802 = vadd.xlane.f32.xlu1 %v801_v18  ;;  %v692_v23 = vpop.xlane.xlu0 %691  ;;  %v768_v25 = vsel %vm671_vm1, %v2020_v16, 0.0 }
 0x2ab   :  { %769 = vadd.xlane.f32.xlu0 %v768_v25  ;;  %1545 = vpow2.f32 %v744_v11  ;;  %v726_v27 = vsub.f32 %v1979_v24, %v692_v23  ;;  %v777_v29 = vsel %vm671_vm1, %v2024_v19, 0.0 }
 0x2ac   :  { %v762_v21 = vmul.f32 1.442695, %v733_v15  ;;  %v2032_v30 = vpop.eup %1537 }
 0x2ad   :  { %v719_v28 = vpop.xlane.xlu1 %718  ;;  %v748_v33 = vmul.f32 1.442695, %v726_v27  ;;  %v798_v24 = vsel %vm671_vm1, %v2032_v30, 0.0 }
 0x2ae   :  { %1547 = vpow2.f32 %v762_v21  ;;  %v735_v14 = vsub.f32 %v1971_v20, %v719_v28  ;;  %778 = vadd.xlane.f32.xlu1 %v777_v29  ;;  %v716_v31 = vpop.xlane.xlu0 %715 }
 0x2af   :  { %1549 = vpow2.f32 %v750_v26  ;;  %v734_v35 = vsub.f32 %v1975_v22, %v716_v31 }
 0x2b0   :  { %v2035_v32 = vpop.eup %1539  ;;  %v766_v34 = vmul.f32 1.442695, %v735_v14 }
 0x2b1   :  { %v774_v36 = vsel %vm671_vm1, %v2035_v32, 0.0  ;;  %v2042_v37 = vpop.eup %1541  ;;  %v764_v38 = vmul.f32 1.442695, %v734_v35 }
 0x2b2   :  { %1551 = vpow2.f32 %v766_v34  ;;  %799 = vadd.xlane.f32.xlu1 %v798_v24  ;;  %775 = vadd.xlane.f32.xlu0 %v774_v36  ;;  %v804_v22 = vsel %vm671_vm1, %v2042_v37, 0.0 }
 0x2b3   :  { %1553 = vpow2.f32 %v748_v33 }
 0x2b4   :  { %v2044_v20 = vpop.eup %1543  ;;  %1555 = vpow2.f32 %v764_v38 }
 0x2b5   :  { %v783_v39 = vsel %vm671_vm1, %v2044_v20, 0.0  ;;  %v2050_v40 = vpop.eup %1545 }
 0x2b6   :  { %784 = vadd.xlane.f32.xlu1 %v783_v39  ;;  %805 = vadd.xlane.f32.xlu0 %v804_v22  ;;  %v780_v43 = vsel %vm671_vm1, %v2050_v40, 0.0 }
 0x2b8   :  { %v2052_v41 = vpop.eup %1547 }
 0x2b9   :  { %v807_v42 = vsel %vm671_vm1, %v2052_v41, 0.0  ;;  %v2058_v44 = vpop.eup %1549 }
 0x2ba   :  { %808 = vadd.xlane.f32.xlu1 %v807_v42  ;;  %781 = vadd.xlane.f32.xlu0 %v780_v43  ;;  %v789_v47 = vsel %vm671_vm1, %v2058_v44, 0.0 }
 0x2bc   :  { %v2060_v45 = vpop.eup %1551 }
 0x2bd   :  { %v813_v46 = vsel %vm671_vm1, %v2060_v45, 0.0  ;;  %v2066_v49 = vpop.eup %1553 }
 0x2be   :  { %814 = vadd.xlane.f32.xlu1 %v813_v46  ;;  %790 = vadd.xlane.f32.xlu0 %v789_v47  ;;  %v786_v50 = vsel %vm671_vm1, %v2066_v49, 0.0  ;;  %v2070_v51 = vpop.eup %1555 }
 0x2bf   :  { %v810_v52 = vsel %vm671_vm1, %v2070_v51, 0.0 }
 0x2c2   :  { %787 = vadd.xlane.f32.xlu0 %v786_v50 }
 0x2c6   :  { %811 = vadd.xlane.f32.xlu0 %v810_v52 }
 0x32f   :  { %v797_v53 = vpop.xlane.xlu1 %796 }
 0x330   :  { %1557 = vrcp.f32 %v797_v53 }
 0x333   :  { %v773_v54 = vpop.xlane.xlu1 %772 }
 0x334   :  { %1559 = vrcp.f32 %v773_v54  ;;  %v794_v55 = vpop.xlane.xlu0 %793 }
 0x335   :  { %1561 = vrcp.f32 %v794_v55 }
 0x337   :  { %v803_v57 = vpop.xlane.xlu1 %802 }
 0x338   :  { %1563 = vrcp.f32 %v803_v57  ;;  %v770_v58 = vpop.xlane.xlu0 %769 }
 0x339   :  { %1565 = vrcp.f32 %v770_v58 }
 0x33a   :  { %v1558_v59 = vpop.eup %1557 }
 0x33b   :  { %v779_v60 = vpop.xlane.xlu1 %778  ;;  %v841_v62 = vmul.f32 %v1558_v59, %v797_v53 }
 0x33d   :  { %v857_v6 = vsub.f32 2.0, %v841_v62 }
 0x33e   :  { %v1560_v0 = vpop.eup %1559 }
 0x33f   :  { %v1562_v1 = vpop.eup %1561  ;;  %v833_v2 = vmul.f32 %v1560_v0, %v773_v54  ;;  %v800_v3 = vpop.xlane.xlu1 %799  ;;  %v873_v12 = vmul.f32 %v1558_v59, %v857_v6 }
 0x340   :  { %v776_v5 = vpop.xlane.xlu0 %775  ;;  %v840_v8 = vmul.f32 %v1562_v1, %v794_v55  ;;  %1567 = vrcp.f32 %v800_v3 }
 0x341   :  { %v849_v9 = vsub.f32 2.0, %v833_v2  ;;  %1569 = vrcp.f32 %v776_v5  ;;  %v889_v25 = vmul.f32 0.125, %v873_v12 }
 0x342   :  { %1571 = vrcp.f32 %v779_v60  ;;  %v1564_v10 = vpop.eup %1563  ;;  %v856_v13 = vsub.f32 2.0, %v840_v8 }
 0x343   :  { %v785_v11 = vpop.xlane.xlu1 %784  ;;  %v865_v18 = vmul.f32 %v1560_v0, %v849_v9  ;;  %v1566_v15 = vpop.eup %1565  ;;  %v843_v23 = vmul.f32 %v1564_v10, %v803_v57  ;;  %v905_v35 = vmul.f32 %v2001_v56, %v889_v25 }
 0x344   :  { %v806_v17 = vpop.xlane.xlu0 %805  ;;  %1573 = vrcp.f32 %v785_v11  ;;  %v872_v26 = vmul.f32 %v1562_v1, %v856_v13  ;;  %v832_v27 = vmul.f32 %v1566_v15, %v770_v58 }
 0x345   :  { %v881_v21 = vmul.f32 0.125, %v865_v18  ;;  %v859_v14 = vsub.f32 2.0, %v843_v23  ;;  %1575 = vrcp.f32 %v806_v17  ;;  %v975_v46 = vsel %vm671_vm1, %v905_v35, 0.0 }
 0x346   :  { %v888_v24 = vmul.f32 0.125, %v872_v26  ;;  %v848_v39 = vsub.f32 2.0, %v832_v27  ;;  %v976_v58 = vrot.slane %v975_v46, 4 }
 0x347   :  { %v809_v28 = vpop.xlane.xlu1 %808  ;;  %v897_v38 = vmul.f32 %v2006_v61, %v881_v21  ;;  %v875_v42 = vmul.f32 %v1564_v10, %v859_v14 }
 0x348   :  { %v782_v31 = vpop.xlane.xlu0 %781  ;;  %1577 = vrcp.f32 %v809_v28  ;;  %v904_v47 = vmul.f32 %v2010_v4, %v888_v24  ;;  %v864_v54 = vmul.f32 %v1566_v15, %v848_v39  ;;  %v977_v9 = vadd.f32 %v976_v58, %v975_v46 }
 0x349   :  { %1579 = vrcp.f32 %v782_v31  ;;  %v919_v53 = vsel %vm671_vm1, %v897_v38, 0.0  ;;  %v891_v55 = vmul.f32 0.125, %v875_v42 }
 0x34a   :  { %v1568_v29 = vpop.eup %1567  ;;  %v920_v62 = vrot.slane %v919_v53, 4  ;;  %v968_v0 = vsel %vm671_vm1, %v904_v47, 0.0  ;;  %v880_v2 = vmul.f32 0.125, %v864_v54 }
 0x34b   :  { %v1570_v33 = vpop.eup %1569  ;;  %v842_v22 = vmul.f32 %v1568_v29, %v800_v3  ;;  %v969_v10 = vrot.slane %v968_v0, 4  ;;  %v815_v14 = vpop.xlane.xlu1 %814 }
 0x34c   :  { %v1572_v34 = vpop.eup %1571  ;;  %v834_v36 = vmul.f32 %v1570_v33, %v776_v5  ;;  %v907_v5 = vmul.f32 %v2014_v7, %v891_v55  ;;  %v921_v18 = vadd.f32 %v920_v62, %v919_v53  ;;  %v896_v23 = vmul.f32 %v2020_v16, %v880_v2 }
 0x34d   :  { %v835_v43 = vmul.f32 %v1572_v34, %v779_v60  ;;  %v858_v56 = vsub.f32 2.0, %v842_v22  ;;  %v2084_v60 = vpop.xlane.xlu0 %790  ;;  %v970_v35 = vadd.f32 %v969_v10, %v968_v0  ;;  %1581 = vrcp.f32 %v815_v14 }
 0x34e   :  { %v850_v50 = vsub.f32 2.0, %v834_v36  ;;  %v1574_v52 = vpop.eup %1573  ;;  %v912_v22 = vsel %vm671_vm1, %v896_v23, 0.0  ;;  %1583 = vrcp.f32 %v2084_v60 }
 0x34f   :  { %v851_v59 = vsub.f32 2.0, %v835_v43  ;;  %v1576_v61 = vpop.eup %1575  ;;  %v837_v1 = vmul.f32 %v1574_v52, %v785_v11  ;;  %v874_v3 = vmul.f32 %v1568_v29, %v858_v56  ;;  %v989_v11 = vsel %vm671_vm1, %v907_v5, 0.0 }
 0x350   :  { %v866_v57 = vmul.f32 %v1570_v33, %v850_v50  ;;  %v844_v13 = vmul.f32 %v1576_v61, %v806_v17  ;;  %v978_v33 = vrot.slane %v977_v9, 2  ;;  %v922_v17 = vrot.slane %v921_v18, 2 }
 0x351   :  { %v867_v12 = vmul.f32 %v1572_v34, %v851_v59  ;;  %v853_v15 = vsub.f32 2.0, %v837_v1  ;;  %v890_v25 = vmul.f32 0.125, %v874_v3  ;;  %v2090_v7 = vpop.xlane.xlu0 %787  ;;  %v990_v16 = vrot.slane %v989_v11, 4 }
 0x352   :  { %v1578_v4 = vpop.eup %1577  ;;  %v882_v6 = vmul.f32 0.125, %v866_v57  ;;  %v860_v26 = vsub.f32 2.0, %v844_v13  ;;  %v979_v46 = vadd.f32 %v978_v33, %v977_v9  ;;  %v971_v47 = vrot.slane %v970_v35, 2 }
 0x353   :  { %v1580_v8 = vpop.eup %1579  ;;  %v845_v27 = vmul.f32 %v1578_v4, %v809_v28  ;;  %v883_v24 = vmul.f32 0.125, %v867_v12  ;;  %v869_v36 = vmul.f32 %v1574_v52, %v853_v15  ;;  %v906_v42 = vmul.f32 %v2032_v30, %v890_v25 }
 0x354   :  { %v898_v21 = vmul.f32 %v2035_v32, %v882_v6  ;;  %v836_v29 = vmul.f32 %v1580_v8, %v782_v31  ;;  %v876_v34 = vmul.f32 %v1576_v61, %v860_v26  ;;  %v923_v55 = vadd.f32 %v922_v17, %v921_v18 }
 0x355   :  { %v861_v38 = vsub.f32 2.0, %v845_v27  ;;  %v899_v50 = vmul.f32 %v2024_v19, %v883_v24  ;;  %v885_v52 = vmul.f32 0.125, %v869_v36  ;;  %v812_v56 = vpop.xlane.xlu0 %811  ;;  %v913_v57 = vrot.slane %v912_v22, 4 }
 0x356   :  { %v852_v39 = vsub.f32 2.0, %v836_v29  ;;  %v926_v32 = vsel %vm671_vm1, %v898_v21, 0.0  ;;  %v892_v28 = vmul.f32 0.125, %v876_v34  ;;  %1585 = vrcp.f32 %v2090_v7 }
 0x357   :  { %v877_v31 = vmul.f32 %v1578_v4, %v861_v38  ;;  %v927_v58 = vrot.slane %v926_v32, 4  ;;  %v991_v30 = vadd.f32 %v990_v16, %v989_v11  ;;  %v982_v59 = vsel %vm671_vm1, %v906_v42, 0.0  ;;  %v1582_v12 = vpop.eup %1581 }
 0x358   :  { %v868_v43 = vmul.f32 %v1580_v8, %v852_v39  ;;  %v908_v61 = vmul.f32 %v2042_v37, %v892_v28  ;;  %v980_v0 = vrot.slane %v979_v46, 1  ;;  %v972_v1 = vadd.f32 %v971_v47, %v970_v35  ;;  %v1584_v25 = vpop.eup %1583 }
 0x359   :  { %v893_v53 = vmul.f32 0.125, %v877_v31  ;;  %1587 = vrcp.f32 %v812_v56  ;;  %v933_v19 = vsel %vm671_vm1, %v899_v50, 0.0  ;;  %v901_v2 = vmul.f32 %v2044_v20, %v885_v52 }
 0x35a   :  { %v884_v54 = vmul.f32 0.125, %v868_v43  ;;  %v914_v5 = vadd.f32 %v913_v57, %v912_v22  ;;  %v983_v6 = vrot.slane %v982_v59, 4  ;;  %v928_v8 = vadd.f32 %v927_v58, %v926_v32 }
 0x35b   :  { %v909_v3 = vmul.f32 %v2052_v41, %v893_v53  ;;  %v924_v9 = vrot.slane %v923_v55, 1  ;;  %v992_v10 = vrot.slane %v991_v30, 2  ;;  %v996_v37 = vsel %vm671_vm1, %v908_v61, 0.0 }
 0x35c   :  { %v900_v62 = vmul.f32 %v2050_v40, %v884_v54  ;;  %v2106_v40 = vadd.f32 %v980_v0, %v979_v46  ;;  %v934_v13 = vrot.slane %v933_v19, 4  ;;  %v973_v15 = vrot.slane %v972_v1, 1 }
 0x35d   :  { %v947_v23 = vsel %vm671_vm1, %v901_v2, 0.0  ;;  %v1003_v20 = vsel %vm671_vm1, %v909_v3, 0.0  ;;  %v847_v41 = vmul.f32 %v1582_v12, %v815_v14  ;;  %v915_v26 = vrot.slane %v914_v5, 2 }
 0x35e   :  { %v940_v4 = vsel %vm671_vm1, %v900_v62, 0.0  ;;  %v984_v11 = vadd.f32 %v983_v6, %v982_v59  ;;  %v929_v21 = vrot.slane %v928_v8, 2  ;;  %v997_v27 = vrot.slane %v996_v37, 4 }
 0x35f   :  { %v941_v18 = vrot.slane %v940_v4, 4  ;;  %v2110_v29 = vadd.f32 %v924_v9, %v923_v55  ;;  %v2112_v33 = vadd.f32 %v992_v10, %v991_v30  ;;  %v863_v35 = vsub.f32 2.0, %v847_v41 }
 0x360   :  { %v839_v24 = vmul.f32 %v1584_v25, %v2084_v60  ;;  %v1586_v34 = vpop.eup %1585  ;;  %v935_v17 = vadd.f32 %v934_v13, %v933_v19  ;;  %v948_v36 = vrot.slane %v947_v23, 4  ;;  %v1004_v38 = vrot.slane %v1003_v20, 4 }
 0x361   :  { %v942_v39 = vadd.f32 %v941_v18, %v940_v4  ;;  %v2115_v16 = vadd.f32 %v973_v15, %v972_v1  ;;  %v879_v14 = vmul.f32 %v1582_v12, %v863_v35  ;;  %v838_v42 = vmul.f32 %v1586_v34, %v2090_v7 }
 0x362   :  { %v855_v22 = vsub.f32 2.0, %v839_v24  ;;  %v916_v28 = vadd.f32 %v915_v26, %v914_v5  ;;  %v985_v31 = vrot.slane %v984_v11, 2  ;;  %v930_v43 = vadd.f32 %v929_v21, %v928_v8 }
 0x363   :  { %v1588_v32 = vpop.eup %1587  ;;  %v998_v46 = vadd.f32 %v997_v27, %v996_v37  ;;  %v895_v47 = vmul.f32 0.125, %v879_v14  ;;  %v854_v52 = vsub.f32 2.0, %v838_v42  ;;  %v936_v53 = vrot.slane %v935_v17, 2 }
 0x364   :  { %v871_v50 = vmul.f32 %v1584_v25, %v855_v22  ;;  %v846_v60 = vmul.f32 %v1588_v32, %v812_v56  ;;  %v949_v54 = vadd.f32 %v948_v36, %v947_v23  ;;  %v1005_v55 = vadd.f32 %v1004_v38, %v1003_v20 }
 0x365   :  { %v943_v57 = vrot.slane %v942_v39, 2  ;;  %v911_v58 = vmul.f32 %v2060_v45, %v895_v47  ;;  %v870_v59 = vmul.f32 %v1586_v34, %v854_v52  ;;  %v917_v61 = vrot.slane %v916_v28, 1 }
 0x366   :  { %v887_v30 = vmul.f32 0.125, %v871_v50  ;;  %v862_v7 = vsub.f32 2.0, %v846_v60  ;;  %v986_v62 = vadd.f32 %v985_v31, %v984_v11  ;;  %v931_v0 = vrot.slane %v930_v43, 1 }
 0x367   :  { %v999_v1 = vrot.slane %v998_v46, 2  ;;  %v1017_v19 = vsel %vm671_vm1, %v911_v58, 0.0  ;;  %v886_v56 = vmul.f32 0.125, %v870_v59  ;;  %v937_v4 = vadd.f32 %v936_v53, %v935_v17 }
 0x368   :  { %v903_v2 = vmul.f32 %v2058_v44, %v887_v30  ;;  %v878_v3 = vmul.f32 %v1588_v32, %v862_v7  ;;  %v950_v5 = vrot.slane %v949_v54, 2  ;;  %v944_v6 = vadd.f32 %v943_v57, %v942_v39 }
 0x369   :  { %v1018_v8 = vrot.slane %v1017_v19, 4  ;;  %v1006_v9 = vrot.slane %v1005_v55, 2  ;;  %v902_v10 = vmul.f32 %v2066_v49, %v886_v56  ;;  %v918_v12 = vadd.f32 %v917_v61, %v916_v28 }
 0x36a   :  { %v961_v45 = vsel %vm671_vm1, %v903_v2, 0.0  ;;  %v894_v37 = vmul.f32 0.125, %v878_v3  ;;  %v987_v13 = vrot.slane %v986_v62, 1  ;;  %v932_v23 = vadd.f32 %v931_v0, %v930_v43 }
 0x36b   :  { %v1019_v18 = vadd.f32 %v1018_v8, %v1017_v19  ;;  %v962_v15 = vrot.slane %v961_v45, 4  ;;  %v1000_v20 = vadd.f32 %v999_v1, %v998_v46  ;;  %v954_v44 = vsel %vm671_vm1, %v902_v10, 0.0  ;;  %v1223_v10 = vld [vmem:[%s2190_s11 + $0x8] sm:$0xff] }
 0x36c   :  { %v910_v41 = vmul.f32 %v2070_v51, %v894_v37  ;;  %v938_v25 = vrot.slane %v937_v4, 1  ;;  %v945_v26 = vrot.slane %v944_v6, 1  ;;  %v955_v21 = vrot.slane %v954_v44, 4 }
 0x36d   :  { %v963_v11 = vadd.f32 %v962_v15, %v961_v45  ;;  %v951_v27 = vadd.f32 %v950_v5, %v949_v54  ;;  %v1007_v35 = vadd.f32 %v1006_v9, %v1005_v55  ;;  %v1020_v24 = vrot.slane %v1019_v18, 2  ;;  %v1222_v45 = vld [vmem:[%s2190_s11] sm:$0xff] }
 0x36e   :  { %v1010_v49 = vsel %vm671_vm1, %v910_v41, 0.0  ;;  %v1033_v34 = vsel %vm1032_vm4, %v2110_v29, %v918_v12  ;;  %v956_v36 = vadd.f32 %v955_v21, %v954_v44  ;;  %v994_v39 = vrot.slane %v2112_v33, 1 }
 0x36f   :  { %v964_v17 = vrot.slane %v963_v11, 2  ;;  %v1011_v38 = vrot.slane %v1010_v49, 4  ;;  %v988_v14 = vadd.f32 %v987_v13, %v986_v62  ;;  %v1035_v51 = vsel %vm1034_vm3, %v932_v23, %v1033_v34 }
 0x370   :  { %v1001_v22 = vrot.slane %v1000_v20, 1  ;;  %v946_v42 = vadd.f32 %v945_v26, %v944_v6  ;;  %v957_v28 = vrot.slane %v956_v36, 2  ;;  %v939_v43 = vadd.f32 %v938_v25, %v937_v4 }
 0x371   :  { %v965_v32 = vadd.f32 %v964_v17, %v963_v11  ;;  %v1012_v31 = vadd.f32 %v1011_v38, %v1010_v49  ;;  %v952_v46 = vrot.slane %v951_v27, 1  ;;  %v1008_v47 = vrot.slane %v1007_v35, 1 }
 0x372   :  { %v1021_v50 = vadd.f32 %v1020_v24, %v1019_v18  ;;  %v1126_v29 = vsel %vm1032_vm4, %v2106_v40, %v2115_v16  ;;  %v958_v52 = vadd.f32 %v957_v28, %v956_v36  ;;  %v1037_v54 = vsel %vm1036_vm5, %v939_v43, %v1035_v51  ;;  %v1205_v18 = vld [vmem:[#allocation8] sm:$0xff] }
 0x373   :  { %v1013_v60 = vrot.slane %v1012_v31, 2  ;;  %v966_v53 = vrot.slane %v965_v32, 1  ;;  %v1127_v55 = vsel %vm1034_vm3, %v988_v14, %v1126_v29  ;;  %v1002_v57 = vadd.f32 %v1001_v22, %v1000_v20 }
 0x374   :  { %v959_v58 = vrot.slane %v958_v52, 1  ;;  %v1039_v59 = vsel %vm1038_vm6, %v946_v42, %v1037_v54  ;;  %v995_v7 = vadd.f32 %v994_v39, %v2112_v33  ;;  %v953_v61 = vadd.f32 %v952_v46, %v951_v27  ;;  %v1356_v42 = vld [vmem:[%s2191_s12] ss:$0 sm:$0xff] }
 0x375   :  { %v1014_v30 = vadd.f32 %v1013_v60, %v1012_v31  ;;  %v1009_v62 = vadd.f32 %v1008_v47, %v1007_v35  ;;  %v1022_v0 = vrot.slane %v1021_v50, 1  ;;  %v967_v1 = vadd.f32 %v966_v53, %v965_v32 }
 0x376   :  { %v960_v40 = vadd.f32 %v959_v58, %v958_v52  ;;  %v1041_v19 = vsel %vm1040_vm7, %v953_v61, %v1039_v59  ;;  %v1128_v2 = vsel %vm1036_vm5, %v995_v7, %v1127_v55  ;;  %v1510_v37 = vpack.c.bf16 %v1223_v10, %v1222_v45 }
 0x377   :  { %v1015_v16 = vrot.slane %v1014_v30, 1  ;;  %v1129_v4 = vsel %vm1038_vm6, %v1002_v57, %v1128_v2  ;;  %v1023_v6 = vadd.f32 %v1022_v0, %v1021_v50  ;;  %v1715_v12 = vmov 0.0|0.0  }
 0x378   :  { %v1043_v56 = vsel %vm1042_vm8, %v960_v40, %v1041_v19  ;;  %v1130_v33 = vsel %vm1040_vm7, %v1009_v62, %v1129_v4  ;;  %1509 = vmatprep.subr.bf16.mxu0 %v1715_v12 }
 0x379   :  { %v1016_v3 = vadd.f32 %v1015_v16, %v1014_v30  ;;  %v1045_v5 = vsel %vm1044_vm9, %v967_v1, %v1043_v56  ;;  %1511 = vmatpush3.bf16.msra.mxu0 %v1510_v37 }
 0x37a   :  { %1467 = vmatmul.mubr.msk.f32.vlgmr.msra.gmra.mrb[10].mxu1 %vm671_vm1, %v1045_v5  ;;  %1512 = vmatprep.subr.bf16.mxu0 %v1715_v12 }
 0x37b   :  { %v1131_v8 = vsel %vm1042_vm8, %v1016_v3, %v1130_v33  ;;  %1470 = vmatpush3.msra.mxu1 %v1947_v63  ;;  %1471 = vmatprep.mubr.msk.f32.mxu1 %vm1714_vm2, %v1713_v48  ;;  %v1224_v48 = vld [vmem:[%s2190_s11 + $0x10] sm:$0xff]  ;;  %v1225_v63 = vld [vmem:[%s2190_s11 + $0x18] sm:$0xff] }
 0x37c   :  { %v1132_v9 = vsel %vm1044_vm9, %v1023_v6, %v1131_v8  ;;  %v1513_v13 = vpack.c.bf16 %v1225_v63, %v1224_v48 }
 0x37e   :  { %1472 = vmatmul.mubr.msk.f32.vlgmr.msra.gmra.mrb[12].mxu1 %vm671_vm1, %v1132_v9  ;;  %1514 = vmatpush3.bf16.msra.mxu0 %v1513_v13 }
 0x44d   :  { %v1114_v15 = vpop.f32.mrb[10].mxu1 }
 0x44e   :  { %v1206_v23 = vmul.f32 %v1205_v18, %v1114_v15  ;;  %v1468_v20 = vpop.f32.mrb[11].mxu1 }
 0x450   :  { %v1208_v44 = vsel %vm115_vm0, %v1206_v23, 0.0 }
 0x451   :  { %v1209_v41 = vrot.slane %v1208_v44, 4  ;;  %v1201_v25 = vpop.f32.mrb[12].mxu1 }
 0x452   :  { %v1207_v26 = vmul.f32 %v1205_v18, %v1201_v25  ;;  %v1473_v11 = vpop.f32.mrb[13].mxu1 }
 0x453   :  { %v1210_v21 = vadd.f32 %v1209_v41, %v1208_v44 }
 0x454   :  { %v1215_v27 = vsel %vm115_vm0, %v1207_v26, 0.0 }
 0x455   :  { %v1211_v35 = vrot.slane %v1210_v21, 2  ;;  %v1216_v24 = vrot.slane %v1215_v27, 4 }
 0x457   :  { %v1212_v49 = vadd.f32 %v1211_v35, %v1210_v21  ;;  %v1217_v34 = vadd.f32 %v1216_v24, %v1215_v27 }
 0x459   :  { %v1218_v17 = vrot.slane %v1217_v34, 2  ;;  %v1213_v36 = vrot.slane %v1212_v49, 1 }
 0x45b   :  { %v1219_v38 = vadd.f32 %v1218_v17, %v1217_v34  ;;  %v1214_v14 = vadd.f32 %v1213_v36, %v1212_v49 }
 0x45d   :  { %v1220_v39 = vrot.slane %v1219_v38, 1 }
 0x45f   :  { %v1221_v51 = vadd.f32 %v1220_v39, %v1219_v38 }
 0x461   :  { %v1235_v22 = vsel %vm1032_vm4, %v1221_v51, %v1214_v14 }
 0x462   :  { %1483 = vmatmul.mubr.msk.f32.vlgmr.msra.gmra.mrb[12].mxu0 %vm115_vm0, %v1235_v22 }
 0x535   :  { %v1304_v32 = vpop.f32.mrb[12].mxu0 }
 0x536   :  { %v1305_v28 = vadd.f32 %v1356_v42, %v1304_v32  ;;  %v1484_v31 = vpop.f32.mrb[13].mxu0 }
 0x538   :  { %1309 = vst.msk [vmem:[#allocation10] sm:$0x3] %vm1308_vm10, %v1305_v28 }
 0x539   :  { %1688 = shalt.err (!%p1685_p8)
}
 0x53a   :  { %s1689_s6 = scalar_lea.hbm %s2192_s13, 32 }
 0x53b   :  { %p1690_p9 = scmp.ne.s32.totalorder %s2192_s13, %s1689_s6  ;;  %p1693_p10 = scmp.lt.u32.totalorder %s1689_s6, %s2192_s13 }
 0x53d   :  { %p1695_p11 = pnand %p1693_p10, %p1690_p9 }
 0x53f   :  { %1698 = shalt.err (!%p1695_p11)
}
 0x540   :  { %1319 = dma.vmem_to_hbm [thread:$0]  %s1317_s30, 32, %s2192_s13, [#allocation4]  }
 0x541   :  { %1705 = dma.done.wait [#allocation4], 32  }
 0x542   :  { %1706 = vsyncadd [#allocation4], 4294967264 }
 0x543   :  { %1323 = vsyncpa [#allocation3], 1 }
 0x544   :  { %1324 = vsyncpa [#allocation6], 1 }
 0x545   :  { %1325 = vsyncpa [#allocation9], 1 }
 0x546   :  { %1326 = vsyncpa [#allocation4], 1 }

// kernel: tpu_custom_call.1
= control target key start
LH: loop header
LB: loop body
LE: loop exit
PB: predicated region body
PF: predicated region fallthrough
CT: control target
= control target key end

     0   :  { %18 = vsyncpa [#allocation3], 0  ;;  %s2179_s0 = inlined_call_operand.hbm [shape: f32[2,8,32], index: 0, kind: input, shape index: {}]   ;;  %s2180_s1 = inlined_call_operand.hbm [shape: f32[2,8,32], index: 1, kind: input, shape index: {}]   ;;  %s2181_s2 = inlined_call_operand.hbm [shape: f32[2,8,32], index: 2, kind: input, shape index: {}]   ;;  %s2182_s3 = inlined_call_operand.vmem [shape: f32[64,32], index: 3, kind: input, shape index: {}]   ;;  %s2183_s4 = inlined_call_operand.hbm [shape: f32[8,32], index: 4, kind: input, shape index: {}]   ;;  %s2184_s5 = inlined_call_operand.vmem [shape: f32[32,32], index: 5, kind: input, shape index: {}]   ;;  %s2185_s6 = inlined_call_operand.vmem [shape: f32[1,32], index: 6, kind: input, shape index: {}]   ;;  %s2186_s7 = inlined_call_operand.vmem [shape: f32[32,32], index: 7, kind: input, shape index: {}]   ;;  %s2187_s8 = inlined_call_operand.vmem [shape: f32[1,32], index: 8, kind: input, shape index: {}]   ;;  %s2188_s9 = inlined_call_operand.vmem [shape: f32[32,32], index: 9, kind: input, shape index: {}]   ;;  %s2189_s10 = inlined_call_operand.vmem [shape: f32[1,32], index: 10, kind: input, shape index: {}]   ;;  %s2190_s11 = inlined_call_operand.vmem [shape: f32[32,32], index: 11, kind: input, shape index: {}]   ;;  %s2191_s12 = inlined_call_operand.vmem [shape: f32[1,32], index: 12, kind: input, shape index: {}]   ;;  %s2192_s13 = inlined_call_operand.hbm [shape: f32[2,32], index: 13, kind: output, shape index: {}]  }
   0x1   :  { %19 = vsyncpa [#allocation6], 0 }
   0x2   :  { %20 = vsyncpa [#allocation9], 0 }
   0x3   :  { %21 = vsyncpa [#allocation4], 0  ;;  %s1707_s25 = smov [#allocation5]   ;;  %s1708_s27 = smov [#allocation2]  }
   0x4   :  { %s39_s26 = sshll.u32 %s1707_s25, 4  ;;  %s27_s28 = sshll.u32 %s1708_s27, 4  ;;  %s40_s26 = int_to_ptr.vmem [resolvable:$true] %s39_s26  ;;  %s1787_s28 = int_to_ptr.vmem [resolvable:$true] %s27_s28 }
   0x5   :  { %s1589_s14 = scalar_lea.hbm %s2180_s1, 256 }
   0x6   :  { %p1590_p0 = scmp.ne.s32.totalorder %s2180_s1, %s1589_s14  ;;  %p1593_p1 = scmp.lt.u32.totalorder %s1589_s14, %s2180_s1 }
   0x8   :  { %p1595_p2 = pnand %p1593_p1, %p1590_p0 }
   0xa   :  { %1598 = shalt.err (!%p1595_p2)
}
   0xb   :  { %s1599_s19 = scalar_lea.vmem %s40_s26, 256  ;;  %p1604_p4 = scmp.lt.s32.totalorder %s40_s26, %s40_s26 }
   0xc   :  { %p1600_p3 = scmp.ne.s32.totalorder %s40_s26, %s1599_s19  ;;  %p1605_p5 = scmp.lt.s32.totalorder %s1599_s19, %s1599_s19 }
   0xe   :  { %p1606_p6 = por %p1605_p5, %p1604_p4 }
  0x10   :  { %p1607_p7 = pnand %p1606_p6, %p1600_p3 }
  0x12   :  { %1610 = shalt.err (!%p1607_p7)
}
  0x13   :  { %s1709_s20 = smov 128   ;;  %s1710_s21 = smov 8  }
  0x14   :  { %45 = dma.hbm_to_vmem [thread:$0]  %s2180_s1, 256, %s40_s26, [#allocation6], %s1709_s20, %s1709_s20, %s1710_s21  }
  0x15   :  { %s1611_s27 = scalar_lea.hbm %s2179_s0, 256 }
  0x16   :  { %p1612_p8 = scmp.ne.s32.totalorder %s2179_s0, %s1611_s27  ;;  %p1615_p9 = scmp.lt.u32.totalorder %s1611_s27, %s2179_s0 }
  0x18   :  { %p1617_p10 = pnand %p1615_p9, %p1612_p8 }
  0x1a   :  { %1620 = shalt.err (!%p1617_p10)
}
  0x1b   :  { %s1621_s16 = scalar_lea.vmem %s1787_s28, 256  ;;  %p1626_p12 = scmp.lt.s32.totalorder %s1787_s28, %s1787_s28 }
  0x1c   :  { %p1622_p11 = scmp.ne.s32.totalorder %s1787_s28, %s1621_s16  ;;  %p1627_p13 = scmp.lt.s32.totalorder %s1621_s16, %s1621_s16 }
  0x1e   :  { %p1628_p0 = por %p1627_p13, %p1626_p12 }
  0x20   :  { %p1629_p1 = pnand %p1628_p0, %p1622_p11 }
  0x22   :  { %1632 = shalt.err (!%p1629_p1)
}
  0x23   :  { %33 = dma.hbm_to_vmem [thread:$0]  %s2179_s0, 256, %s1787_s28, [#allocation3], %s1709_s20, %s1709_s20, %s1710_s21  }
  0x24   :  { %s1711_s17 = smov [#allocation7]   ;;  %s1712_s19 = smov [#allocation8]  }
  0x25   :  { %s51_s18 = sshll.u32 %s1711_s17, 4  ;;  %s66_s22 = sshll.u32 %s1712_s19, 4  ;;  %s52_s18 = int_to_ptr.vmem [resolvable:$true] %s51_s18  ;;  %s67_s22 = int_to_ptr.vmem [resolvable:$true] %s66_s22 }
  0x26   :  { %s1633_s25 = scalar_lea.hbm %s2181_s2, 256 }
  0x27   :  { %p1634_p2 = scmp.ne.s32.totalorder %s2181_s2, %s1633_s25  ;;  %p1637_p3 = scmp.lt.u32.totalorder %s1633_s25, %s2181_s2 }
  0x29   :  { %p1639_p4 = pnand %p1637_p3, %p1634_p2 }
  0x2b   :  { %1642 = shalt.err (!%p1639_p4)
}
  0x2c   :  { %s1643_s0 = scalar_lea.vmem %s52_s18, 256  ;;  %p1648_p6 = scmp.lt.s32.totalorder %s52_s18, %s52_s18 }
  0x2d   :  { %p1644_p5 = scmp.ne.s32.totalorder %s52_s18, %s1643_s0  ;;  %p1649_p7 = scmp.lt.s32.totalorder %s1643_s0, %s1643_s0 }
  0x2f   :  { %p1650_p8 = por %p1649_p7, %p1648_p6 }
  0x31   :  { %p1651_p9 = pnand %p1650_p8, %p1644_p5 }
  0x33   :  { %1654 = shalt.err (!%p1651_p9)
}
  0x34   :  { %57 = dma.hbm_to_vmem [thread:$0]  %s2181_s2, 256, %s52_s18, [#allocation6], %s1709_s20, %s1709_s20, %s1710_s21  }
  0x35   :  { %s1655_s26 = scalar_lea.hbm %s2183_s4, 128 }
  0x36   :  { %p1656_p10 = scmp.ne.s32.totalorder %s2183_s4, %s1655_s26  ;;  %p1659_p11 = scmp.lt.u32.totalorder %s1655_s26, %s2183_s4 }
  0x38   :  { %p1661_p12 = pnand %p1659_p11, %p1656_p10 }
  0x3a   :  { %1664 = shalt.err (!%p1661_p12)
}
  0x3b   :  { %s1665_s25 = scalar_lea.vmem %s67_s22, 128  ;;  %p1670_p0 = scmp.lt.s32.totalorder %s67_s22, %s67_s22 }
  0x3c   :  { %p1666_p13 = scmp.ne.s32.totalorder %s67_s22, %s1665_s25  ;;  %p1671_p1 = scmp.lt.s32.totalorder %s1665_s25, %s1665_s25 }
  0x3e   :  { %p1672_p2 = por %p1671_p1, %p1670_p0 }
  0x40   :  { %p1673_p3 = pnand %p1672_p2, %p1666_p13 }
  0x42   :  { %1676 = shalt.err (!%p1673_p3)
}
  0x43   :  { %69 = dma.hbm_to_vmem [thread:$0]  %s2183_s4, 128, %s67_s22, [#allocation9]  }
  0x44   :  { %1699 = dma.done.wait [#allocation3], 256  }
  0x45   :  { %1700 = vsyncadd [#allocation3], 4294967040 }
  0x46   :  { %1701 = dma.done.wait [#allocation6], 512  }
  0x47   :  { %1702 = vsyncadd [#allocation6], 4294966784 }
  0x48   :  { %1703 = dma.done.wait [#allocation9], 128  }
  0x49   :  { %1704 = vsyncadd [#allocation9], 4294967168  ;;  %v104_v0 = vld [vmem:[%s2184_s5] sm:$0xff]  ;;  %v105_v1 = vld [vmem:[%s2184_s5 + $0x8] sm:$0xff]  ;;  %vm115_vm0 = vcmask 261120   ;;  %v1713_v48 = vmov 0.0  }
  0x4a   :  { %v199_v2 = vld [vmem:[%s2186_s7] sm:$0xff]  ;;  %v1485_v3 = vpack.c.bf16 %v105_v1, %v104_v0  ;;  %v200_v4 = vld [vmem:[%s2186_s7 + $0x8] sm:$0xff]  ;;  %v106_v5 = vld [vmem:[%s2184_s5 + $0x10] sm:$0xff]  ;;  %vm671_vm1 = vcmask 64512   ;;  %vm1714_vm2 = vmmov 0   ;;  %vm1034_vm3 = vcmask 1042434  }
  0x4b   :  { %v107_v6 = vld [vmem:[%s2184_s5 + $0x18] sm:$0xff]  ;;  %v1493_v7 = vpack.c.bf16 %v200_v4, %v199_v2  ;;  %v201_v9 = vld [vmem:[%s2186_s7 + $0x10] sm:$0xff]  ;;  %v98_v11 = vld [vmem:[#allocation2] sm:$0xff]  ;;  %vm1032_vm4 = vcmask 1041409   ;;  %vm1036_vm5 = vcmask 1043459   ;;  %vm1038_vm6 = vcmask 1044484  }
  0x4c   :  { %v1489_v8 = vpack.c.bf16 %v107_v6, %v106_v5  ;;  %v202_v10 = vld [vmem:[%s2186_s7 + $0x18] sm:$0xff]  ;;  %1486 = vmatprep.subr.bf16.mxu0 %v1485_v3  ;;  %1411 = vmatprep.mubr.msk.f32.mxu0 %vm115_vm0, %v98_v11  ;;  %v100_v13 = vld [vmem:[#allocation5] sm:$0xff]  ;;  %v291_v14 = vld [vmem:[%s2188_s9] sm:$0xff]  ;;  %vm1040_vm7 = vcmask 1045509   ;;  %vm1042_vm8 = vcmask 1046534   ;;  %vm1044_vm9 = vcmask 1047559  }
  0x4d   :  { %v1497_v12 = vpack.c.bf16 %v202_v10, %v201_v9  ;;  %1494 = vmatprep.subr.bf16.mxu1 %v1493_v7  ;;  %1488 = vmatpush3.bf16.msra.mxu0 %v1485_v3  ;;  %v292_v15 = vld [vmem:[%s2188_s9 + $0x8] sm:$0xff]  ;;  %v293_v17 = vld [vmem:[%s2188_s9 + $0x10] sm:$0xff]  ;;  %v294_v18 = vld [vmem:[%s2188_s9 + $0x18] sm:$0xff]  ;;  %s1716_s29 = smov [#allocation10]   ;;  %vm1308_vm10 = vcmask 254976  }
  0x4e   :  { %1496 = vmatpush3.bf16.msra.mxu1 %v1493_v7  ;;  %1490 = vmatprep.subr.bf16.mxu0 %v1489_v8  ;;  %v1501_v16 = vpack.c.bf16 %v292_v15, %v291_v14  ;;  %v99_v19 = vld [vmem:[#allocation2 + $0x8] sm:$0xff]  ;;  %v101_v20 = vld [vmem:[#allocation5 + $0x8] sm:$0xff]  ;;  %v1505_v21 = vpack.c.bf16 %v294_v18, %v293_v17  ;;  %v102_v22 = vld [vmem:[#allocation7] sm:$0xff]  ;;  %s1316_s30 = sshll.u32 %s1716_s29, 4  ;;  %s1317_s30 = int_to_ptr.vmem [resolvable:$true] %s1316_s30 }
  0x4f   :  { %1498 = vmatprep.subr.bf16.mxu1 %v1497_v12  ;;  %1422 = vmatprep.mubr.msk.f32.mxu1 %vm115_vm0, %v100_v13  ;;  %v103_v23 = vld [vmem:[#allocation7 + $0x8] sm:$0xff]  ;;  %v1327_v24 = vld [vmem:[%s2185_s6] ss:$0 sm:$0xff]  ;;  %v385_v38 = vld [vmem:[%s2182_s3 + $0x10] sm:$0xff]  ;;  %s1677_s14 = scalar_lea.vmem %s1317_s30, 32  ;;  %p1682_p5 = scmp.lt.s32.totalorder %s1317_s30, %s1317_s30 }
  0x50   :  { %v1330_v25 = vld [vmem:[%s2187_s8] ss:$0 sm:$0xff]  ;;  %v384_v34 = vld [vmem:[%s2182_s3 + $0x8] sm:$0xff]  ;;  %v386_v44 = vld [vmem:[%s2182_s3 + $0x18] sm:$0xff]  ;;  %p1678_p4 = scmp.ne.s32.totalorder %s1317_s30, %s1677_s14  ;;  %p1683_p6 = scmp.lt.s32.totalorder %s1677_s14, %s1677_s14 }
  0x51   :  { %1492 = vmatpush3.bf16.msra.mxu0 %v1489_v8  ;;  %v383_v33 = vld [vmem:[%s2182_s3] sm:$0xff]  ;;  %v388_v51 = vld [vmem:[%s2182_s3 + $0x28] sm:$0xff]  ;;  %v389_v53 = vld [vmem:[%s2182_s3 + $0x30] sm:$0xff] }
  0x52   :  { %1500 = vmatpush3.bf16.msra.mxu1 %v1497_v12  ;;  %1502 = vmatprep.subr.bf16.mxu0 %v1501_v16  ;;  %v387_v46 = vld [vmem:[%s2182_s3 + $0x20] sm:$0xff]  ;;  %v390_v57 = vld [vmem:[%s2182_s3 + $0x38] sm:$0xff]  ;;  %p1684_p7 = por %p1683_p6, %p1682_p5 }
  0x53   :  { %v1333_v61 = vld [vmem:[%s2189_s10] ss:$0 sm:$0xff] }
  0x54   :  { %1412 = vmatmul.mubr.msk.f32.vlgmr.msra.gmra.mrb[0].mxu0 %vm115_vm0, %v99_v19  ;;  %p1685_p8 = pnand %p1684_p7, %p1678_p4 }
  0x55   :  { %1423 = vmatmul.mubr.msk.f32.vlgmr.msra.gmra.mrb[0].mxu1 %vm115_vm0, %v101_v20  ;;  %1504 = vmatpush3.bf16.msra.mxu0 %v1501_v16 }
  0x56   :  { %1506 = vmatprep.subr.bf16.mxu0 %v1505_v21  ;;  %1433 = vmatprep.mubr.msk.f32.mxu0 %vm115_vm0, %v102_v22 }
  0x59   :  { %1508 = vmatpush3.bf16.msra.mxu0 %v1505_v21 }
  0x5c   :  { %1434 = vmatmul.mubr.msk.f32.vlgmr.msra.gmra.mrb[2].mxu0 %vm115_vm0, %v103_v23 }
 0x127   :  { %v1413_v26 = vpop.f32.mrb[0].mxu0 }
 0x128   :  { %v194_v27 = vadd.f32 %v1413_v26, %v1327_v24  ;;  %v1424_v28 = vpop.f32.mrb[0].mxu1  ;;  %v188_v29 = vpop.f32.mrb[1].mxu0 }
 0x129   :  { %v288_v30 = vadd.f32 %v1424_v28, %v1330_v25  ;;  %v189_v31 = vadd.f32 %v1327_v24, %v188_v29  ;;  %v282_v32 = vpop.f32.mrb[1].mxu1 }
 0x12a   :  { %v198_v35 = vmul.f32 0.5, %v194_v27  ;;  %v283_v36 = vadd.f32 %v1330_v25, %v282_v32 }
 0x12b   :  { %v197_v37 = vmul.f32 0.5, %v189_v31  ;;  %1450 = vmatprep.subr.msk.mxu0 %vm115_vm0, %v288_v30 }
 0x12c   :  { %1436 = vmatprep.subr.msk.mxu1 %vm115_vm0, %v283_v36  ;;  %1451 = vmatpush3.xpose.msk.msra.mxu0 %vm115_vm0, %v288_v30  ;;  %v399_v39 = vmul.f32 %v383_v33, %v198_v35  ;;  %v400_v40 = vmul.f32 %v384_v34, %v198_v35  ;;  %v401_v43 = vmul.f32 %v385_v38, %v198_v35 }
 0x12d   :  { %1437 = vmatpush3.xpose.msk.msra.mxu1 %vm115_vm0, %v283_v36  ;;  %v391_v41 = vmul.f32 %v383_v33, %v197_v37  ;;  %v392_v42 = vmul.f32 %v384_v34, %v197_v37  ;;  %v393_v45 = vmul.f32 %v385_v38, %v197_v37  ;;  %v402_v47 = vmul.f32 %v386_v44, %v198_v35 }
 0x12e   :  { %1452 = vmatprep.mubr.msk.f32.mxu0 %vm115_vm0, %v399_v39  ;;  %1464 = vmatprep.subr.mxu1 %v1713_v48  ;;  %v394_v49 = vmul.f32 %v386_v44, %v197_v37  ;;  %v403_v50 = vmul.f32 %v387_v46, %v198_v35  ;;  %v395_v52 = vmul.f32 %v387_v46, %v197_v37 }
 0x12f   :  { %1438 = vmatprep.mubr.msk.f32.mxu1 %vm115_vm0, %v391_v41  ;;  %1453 = vmatmul.mubr.msk.f32.vlgmr.msra.gmra.mrb[4].mxu0 %vm115_vm0, %v400_v40  ;;  %v404_v54 = vmul.f32 %v388_v51, %v198_v35  ;;  %v396_v55 = vmul.f32 %v388_v51, %v197_v37  ;;  %v405_v56 = vmul.f32 %v389_v53, %v198_v35  ;;  %v1435_v62 = vpop.f32.mrb[2].mxu0 }
 0x130   :  { %1439 = vmatmul.mubr.msk.f32.vlgmr.msra.gmra.mrb[2].mxu1 %vm115_vm0, %v392_v42  ;;  %1455 = vmatprep.mubr.msk.f32.mxu0 %vm115_vm0, %v401_v43  ;;  %v397_v58 = vmul.f32 %v389_v53, %v197_v37  ;;  %v406_v59 = vmul.f32 %v390_v57, %v198_v35  ;;  %v398_v60 = vmul.f32 %v390_v57, %v197_v37  ;;  %v374_v0 = vpop.f32.mrb[3].mxu0 }
 0x131   :  { %1441 = vmatprep.mubr.msk.f32.mxu1 %vm115_vm0, %v393_v45  ;;  %v1947_v63 = vadd.f32 %v1435_v62, %v1333_v61  ;;  %v375_v1 = vadd.f32 %v1333_v61, %v374_v0 }
 0x133   :  { %1456 = vmatmul.mubr.msk.f32.gmra.mrb[6].mxu0 %vm115_vm0, %v402_v47  ;;  %1465 = vmatpush3.msra.mxu1 %v375_v1 }
 0x134   :  { %1442 = vmatmul.mubr.msk.f32.gmra.mrb[4].mxu1 %vm115_vm0, %v394_v49  ;;  %1458 = vmatprep.mubr.msk.f32.mxu0 %vm115_vm0, %v403_v50 }
 0x135   :  { %1444 = vmatprep.mubr.msk.f32.mxu1 %vm115_vm0, %v395_v52  ;;  %1469 = vmatprep.subr.mxu1 %v1713_v48 }
 0x137   :  { %1459 = vmatmul.mubr.msk.f32.gmra.mrb[8].mxu0 %vm115_vm0, %v404_v54 }
 0x138   :  { %1445 = vmatmul.mubr.msk.f32.gmra.mrb[6].mxu1 %vm115_vm0, %v396_v55  ;;  %1461 = vmatprep.mubr.msk.f32.mxu0 %vm115_vm0, %v405_v56 }
 0x139   :  { %1447 = vmatprep.mubr.msk.f32.mxu1 %vm115_vm0, %v397_v58 }
 0x13b   :  { %1462 = vmatmul.mubr.msk.f32.gmra.mrb[10].mxu0 %vm115_vm0, %v406_v59 }
 0x13c   :  { %1448 = vmatmul.mubr.msk.f32.gmra.mrb[8].mxu1 %vm115_vm0, %v398_v60  ;;  %1482 = vmatprep.mubr.msk.f32.mxu0 %vm1714_vm2, %v1713_v48 }
 0x13d   :  { %1466 = vmatprep.mubr.msk.f32.mxu1 %vm1714_vm2, %v1713_v48 }
 0x202   :  { %v1454_v2 = vpop.f32.mrb[4].mxu0 }
 0x203   :  { %v1440_v3 = vpop.f32.mrb[2].mxu1  ;;  %v632_v4 = vpop.f32.mrb[5].mxu0  ;;  %v699_v5 = vsel %vm671_vm1, %v1454_v2, -inf }
 0x204   :  { %700 = vmax.xlane.f32.xlu1 %v699_v5  ;;  %v1951_v6 = vpop.f32.mrb[3].mxu1  ;;  %v675_v7 = vsel %vm671_vm1, %v1440_v3, -inf  ;;  %v696_v13 = vsel %vm671_vm1, %v632_v4, -inf }
 0x205   :  { %676 = vmax.xlane.f32.xlu0 %v675_v7  ;;  %v672_v19 = vsel %vm671_vm1, %v1951_v6, -inf }
 0x206   :  { %v1457_v8 = vpop.f32.mrb[6].mxu0 }
 0x207   :  { %v1443_v9 = vpop.f32.mrb[4].mxu1  ;;  %v1954_v10 = vpop.f32.mrb[7].mxu0  ;;  %v705_v11 = vsel %vm671_vm1, %v1457_v8, -inf }
 0x208   :  { %706 = vmax.xlane.f32.xlu1 %v705_v11  ;;  %v1957_v12 = vpop.f32.mrb[5].mxu1  ;;  %v681_v17 = vsel %vm671_vm1, %v1443_v9, -inf  ;;  %v702_v23 = vsel %vm671_vm1, %v1954_v10, -inf }
 0x209   :  { %697 = vmax.xlane.f32.xlu0 %v696_v13  ;;  %v678_v26 = vsel %vm671_vm1, %v1957_v12, -inf }
 0x20a   :  { %v1960_v14 = vpop.f32.mrb[8].mxu0 }
 0x20b   :  { %v1962_v15 = vpop.f32.mrb[6].mxu1  ;;  %v1964_v16 = vpop.f32.mrb[9].mxu0  ;;  %v711_v30 = vsel %vm671_vm1, %v1960_v14, -inf }
 0x20c   :  { %682 = vmax.xlane.f32.xlu1 %v681_v17  ;;  %v1967_v18 = vpop.f32.mrb[7].mxu1  ;;  %v708_v25 = vsel %vm671_vm1, %v1964_v16, -inf  ;;  %v687_v28 = vsel %vm671_vm1, %v1962_v15, -inf }
 0x20d   :  { %673 = vmax.xlane.f32.xlu0 %v672_v19  ;;  %v684_v27 = vsel %vm671_vm1, %v1967_v18, -inf }
 0x20e   :  { %v1971_v20 = vpop.f32.mrb[10].mxu0 }
 0x20f   :  { %v1973_v21 = vpop.f32.mrb[8].mxu1  ;;  %v1975_v22 = vpop.f32.mrb[11].mxu0  ;;  %v717_v32 = vsel %vm671_vm1, %v1971_v20, -inf }
 0x210   :  { %703 = vmax.xlane.f32.xlu1 %v702_v23  ;;  %v1979_v24 = vpop.f32.mrb[9].mxu1  ;;  %v693_v29 = vsel %vm671_vm1, %v1973_v21, -inf  ;;  %v714_v33 = vsel %vm671_vm1, %v1975_v22, -inf }
 0x211   :  { %709 = vmax.xlane.f32.xlu0 %v708_v25  ;;  %v690_v31 = vsel %vm671_vm1, %v1979_v24, -inf }
 0x214   :  { %679 = vmax.xlane.f32.xlu1 %v678_v26 }
 0x215   :  { %685 = vmax.xlane.f32.xlu0 %v684_v27 }
 0x218   :  { %688 = vmax.xlane.f32.xlu1 %v687_v28 }
 0x219   :  { %694 = vmax.xlane.f32.xlu0 %v693_v29 }
 0x21c   :  { %712 = vmax.xlane.f32.xlu1 %v711_v30 }
 0x21d   :  { %691 = vmax.xlane.f32.xlu0 %v690_v31 }
 0x220   :  { %718 = vmax.xlane.f32.xlu1 %v717_v32 }
 0x221   :  { %715 = vmax.xlane.f32.xlu0 %v714_v33 }
 0x291   :  { %v701_v34 = vpop.xlane.xlu1 %700 }
 0x292   :  { %v729_v35 = vsub.f32 %v1454_v2, %v701_v34  ;;  %v677_v36 = vpop.xlane.xlu0 %676 }
 0x293   :  { %v721_v37 = vsub.f32 %v1440_v3, %v677_v36 }
 0x294   :  { %v754_v38 = vmul.f32 1.442695, %v729_v35 }
 0x295   :  { %v738_v39 = vmul.f32 1.442695, %v721_v37  ;;  %v707_v40 = vpop.xlane.xlu1 %706 }
 0x296   :  { %1525 = vpow2.f32 %v754_v38  ;;  %v731_v41 = vsub.f32 %v1457_v8, %v707_v40  ;;  %v698_v42 = vpop.xlane.xlu0 %697 }
 0x297   :  { %v728_v43 = vsub.f32 %v632_v4, %v698_v42  ;;  %1527 = vpow2.f32 %v738_v39 }
 0x298   :  { %v758_v44 = vmul.f32 1.442695, %v731_v41 }
 0x299   :  { %v752_v45 = vmul.f32 1.442695, %v728_v43  ;;  %v683_v46 = vpop.xlane.xlu1 %682 }
 0x29a   :  { %v723_v47 = vsub.f32 %v1443_v9, %v683_v46  ;;  %v674_v49 = vpop.xlane.xlu0 %673 }
 0x29b   :  { %1529 = vpow2.f32 %v752_v45  ;;  %v720_v50 = vsub.f32 %v1951_v6, %v674_v49 }
 0x29c   :  { %1531 = vpow2.f32 %v758_v44  ;;  %v742_v51 = vmul.f32 1.442695, %v723_v47 }
 0x29d   :  { %v736_v52 = vmul.f32 1.442695, %v720_v50  ;;  %v704_v53 = vpop.xlane.xlu1 %703 }
 0x29e   :  { %v730_v54 = vsub.f32 %v1954_v10, %v704_v53  ;;  %v710_v55 = vpop.xlane.xlu0 %709 }
 0x29f   :  { %1533 = vpow2.f32 %v736_v52  ;;  %v732_v58 = vsub.f32 %v1964_v16, %v710_v55 }
 0x2a0   :  { %v2001_v56 = vpop.eup %1525  ;;  %1535 = vpow2.f32 %v742_v51  ;;  %v756_v57 = vmul.f32 1.442695, %v730_v54 }
 0x2a1   :  { %v680_v59 = vpop.xlane.xlu1 %679  ;;  %v795_v60 = vsel %vm671_vm1, %v2001_v56, 0.0  ;;  %v2006_v61 = vpop.eup %1527  ;;  %v760_v1 = vmul.f32 1.442695, %v732_v58 }
 0x2a2   :  { %v722_v62 = vsub.f32 %v1957_v12, %v680_v59  ;;  %796 = vadd.xlane.f32.xlu1 %v795_v60  ;;  %v686_v0 = vpop.xlane.xlu0 %685  ;;  %1537 = vpow2.f32 %v756_v57  ;;  %v771_v6 = vsel %vm671_vm1, %v2006_v61, 0.0 }
 0x2a3   :  { %v724_v3 = vsub.f32 %v1967_v18, %v686_v0 }
 0x2a4   :  { %v740_v2 = vmul.f32 1.442695, %v722_v62 }
 0x2a5   :  { %v2010_v4 = vpop.eup %1529  ;;  %v689_v5 = vpop.xlane.xlu1 %688  ;;  %v744_v11 = vmul.f32 1.442695, %v724_v3 }
 0x2a6   :  { %v2014_v7 = vpop.eup %1531  ;;  %1539 = vpow2.f32 %v740_v2  ;;  %v725_v8 = vsub.f32 %v1962_v15, %v689_v5  ;;  %772 = vadd.xlane.f32.xlu1 %v771_v6  ;;  %v695_v9 = vpop.xlane.xlu0 %694  ;;  %v792_v10 = vsel %vm671_vm1, %v2010_v4, 0.0 }
 0x2a7   :  { %793 = vadd.xlane.f32.xlu0 %v792_v10  ;;  %1541 = vpow2.f32 %v760_v1  ;;  %v727_v13 = vsub.f32 %v1973_v21, %v695_v9  ;;  %v801_v18 = vsel %vm671_vm1, %v2014_v7, 0.0 }
 0x2a8   :  { %v746_v12 = vmul.f32 1.442695, %v725_v8 }
 0x2a9   :  { %v2020_v16 = vpop.eup %1533  ;;  %v713_v17 = vpop.xlane.xlu1 %712  ;;  %v750_v26 = vmul.f32 1.442695, %v727_v13 }
 0x2aa   :  { %v2024_v19 = vpop.eup %1535  ;;  %1543 = vpow2.f32 %v746_v12  ;;  %v733_v15 = vsub.f32 %v1960_v14, %v713_v17  ;;  %802 = vadd.xlane.f32.xlu1 %v801_v18  ;;  %v692_v23 = vpop.xlane.xlu0 %691  ;;  %v768_v25 = vsel %vm671_vm1, %v2020_v16, 0.0 }
 0x2ab   :  { %769 = vadd.xlane.f32.xlu0 %v768_v25  ;;  %1545 = vpow2.f32 %v744_v11  ;;  %v726_v27 = vsub.f32 %v1979_v24, %v692_v23  ;;  %v777_v29 = vsel %vm671_vm1, %v2024_v19, 0.0 }
 0x2ac   :  { %v762_v21 = vmul.f32 1.442695, %v733_v15  ;;  %v2032_v30 = vpop.eup %1537 }
 0x2ad   :  { %v719_v28 = vpop.xlane.xlu1 %718  ;;  %v748_v33 = vmul.f32 1.442695, %v726_v27  ;;  %v798_v24 = vsel %vm671_vm1, %v2032_v30, 0.0 }
 0x2ae   :  { %1547 = vpow2.f32 %v762_v21  ;;  %v735_v14 = vsub.f32 %v1971_v20, %v719_v28  ;;  %778 = vadd.xlane.f32.xlu1 %v777_v29  ;;  %v716_v31 = vpop.xlane.xlu0 %715 }
 0x2af   :  { %1549 = vpow2.f32 %v750_v26  ;;  %v734_v35 = vsub.f32 %v1975_v22, %v716_v31 }
 0x2b0   :  { %v2035_v32 = vpop.eup %1539  ;;  %v766_v34 = vmul.f32 1.442695, %v735_v14 }
 0x2b1   :  { %v774_v36 = vsel %vm671_vm1, %v2035_v32, 0.0  ;;  %v2042_v37 = vpop.eup %1541  ;;  %v764_v38 = vmul.f32 1.442695, %v734_v35 }
 0x2b2   :  { %1551 = vpow2.f32 %v766_v34  ;;  %799 = vadd.xlane.f32.xlu1 %v798_v24  ;;  %775 = vadd.xlane.f32.xlu0 %v774_v36  ;;  %v804_v22 = vsel %vm671_vm1, %v2042_v37, 0.0 }
 0x2b3   :  { %1553 = vpow2.f32 %v748_v33 }
 0x2b4   :  { %v2044_v20 = vpop.eup %1543  ;;  %1555 = vpow2.f32 %v764_v38 }
 0x2b5   :  { %v783_v39 = vsel %vm671_vm1, %v2044_v20, 0.0  ;;  %v2050_v40 = vpop.eup %1545 }
 0x2b6   :  { %784 = vadd.xlane.f32.xlu1 %v783_v39  ;;  %805 = vadd.xlane.f32.xlu0 %v804_v22  ;;  %v780_v43 = vsel %vm671_vm1, %v2050_v40, 0.0 }
 0x2b8   :  { %v2052_v41 = vpop.eup %1547 }
 0x2b9   :  { %v807_v42 = vsel %vm671_vm1, %v2052_v41, 0.0  ;;  %v2058_v44 = vpop.eup %1549 }
 0x2ba   :  { %808 = vadd.xlane.f32.xlu1 %v807_v42  ;;  %781 = vadd.xlane.f32.xlu0 %v780_v43  ;;  %v789_v47 = vsel %vm671_vm1, %v2058_v44, 0.0 }
 0x2bc   :  { %v2060_v45 = vpop.eup %1551 }
 0x2bd   :  { %v813_v46 = vsel %vm671_vm1, %v2060_v45, 0.0  ;;  %v2066_v49 = vpop.eup %1553 }
 0x2be   :  { %814 = vadd.xlane.f32.xlu1 %v813_v46  ;;  %790 = vadd.xlane.f32.xlu0 %v789_v47  ;;  %v786_v50 = vsel %vm671_vm1, %v2066_v49, 0.0  ;;  %v2070_v51 = vpop.eup %1555 }
 0x2bf   :  { %v810_v52 = vsel %vm671_vm1, %v2070_v51, 0.0 }
 0x2c2   :  { %787 = vadd.xlane.f32.xlu0 %v786_v50 }
 0x2c6   :  { %811 = vadd.xlane.f32.xlu0 %v810_v52 }
 0x32f   :  { %v797_v53 = vpop.xlane.xlu1 %796 }
 0x330   :  { %1557 = vrcp.f32 %v797_v53 }
 0x333   :  { %v773_v54 = vpop.xlane.xlu1 %772 }
 0x334   :  { %1559 = vrcp.f32 %v773_v54  ;;  %v794_v55 = vpop.xlane.xlu0 %793 }
 0x335   :  { %1561 = vrcp.f32 %v794_v55 }
 0x337   :  { %v803_v57 = vpop.xlane.xlu1 %802 }
 0x338   :  { %1563 = vrcp.f32 %v803_v57  ;;  %v770_v58 = vpop.xlane.xlu0 %769 }
 0x339   :  { %1565 = vrcp.f32 %v770_v58 }
 0x33a   :  { %v1558_v59 = vpop.eup %1557 }
 0x33b   :  { %v779_v60 = vpop.xlane.xlu1 %778  ;;  %v841_v62 = vmul.f32 %v1558_v59, %v797_v53 }
 0x33d   :  { %v857_v6 = vsub.f32 2.0, %v841_v62 }
 0x33e   :  { %v1560_v0 = vpop.eup %1559 }
 0x33f   :  { %v1562_v1 = vpop.eup %1561  ;;  %v833_v2 = vmul.f32 %v1560_v0, %v773_v54  ;;  %v800_v3 = vpop.xlane.xlu1 %799  ;;  %v873_v12 = vmul.f32 %v1558_v59, %v857_v6 }
 0x340   :  { %v776_v5 = vpop.xlane.xlu0 %775  ;;  %v840_v8 = vmul.f32 %v1562_v1, %v794_v55  ;;  %1567 = vrcp.f32 %v800_v3 }
 0x341   :  { %v849_v9 = vsub.f32 2.0, %v833_v2  ;;  %1569 = vrcp.f32 %v776_v5  ;;  %v889_v25 = vmul.f32 0.125, %v873_v12 }
 0x342   :  { %1571 = vrcp.f32 %v779_v60  ;;  %v1564_v10 = vpop.eup %1563  ;;  %v856_v13 = vsub.f32 2.0, %v840_v8 }
 0x343   :  { %v785_v11 = vpop.xlane.xlu1 %784  ;;  %v865_v18 = vmul.f32 %v1560_v0, %v849_v9  ;;  %v1566_v15 = vpop.eup %1565  ;;  %v843_v23 = vmul.f32 %v1564_v10, %v803_v57  ;;  %v905_v35 = vmul.f32 %v2001_v56, %v889_v25 }
 0x344   :  { %v806_v17 = vpop.xlane.xlu0 %805  ;;  %1573 = vrcp.f32 %v785_v11  ;;  %v872_v26 = vmul.f32 %v1562_v1, %v856_v13  ;;  %v832_v27 = vmul.f32 %v1566_v15, %v770_v58 }
 0x345   :  { %v881_v21 = vmul.f32 0.125, %v865_v18  ;;  %v859_v14 = vsub.f32 2.0, %v843_v23  ;;  %1575 = vrcp.f32 %v806_v17  ;;  %v975_v46 = vsel %vm671_vm1, %v905_v35, 0.0 }
 0x346   :  { %v888_v24 = vmul.f32 0.125, %v872_v26  ;;  %v848_v39 = vsub.f32 2.0, %v832_v27  ;;  %v976_v58 = vrot.slane %v975_v46, 4 }
 0x347   :  { %v809_v28 = vpop.xlane.xlu1 %808  ;;  %v897_v38 = vmul.f32 %v2006_v61, %v881_v21  ;;  %v875_v42 = vmul.f32 %v1564_v10, %v859_v14 }
 0x348   :  { %v782_v31 = vpop.xlane.xlu0 %781  ;;  %1577 = vrcp.f32 %v809_v28  ;;  %v904_v47 = vmul.f32 %v2010_v4, %v888_v24  ;;  %v864_v54 = vmul.f32 %v1566_v15, %v848_v39  ;;  %v977_v9 = vadd.f32 %v976_v58, %v975_v46 }
 0x349   :  { %1579 = vrcp.f32 %v782_v31  ;;  %v919_v53 = vsel %vm671_vm1, %v897_v38, 0.0  ;;  %v891_v55 = vmul.f32 0.125, %v875_v42 }
 0x34a   :  { %v1568_v29 = vpop.eup %1567  ;;  %v920_v62 = vrot.slane %v919_v53, 4  ;;  %v968_v0 = vsel %vm671_vm1, %v904_v47, 0.0  ;;  %v880_v2 = vmul.f32 0.125, %v864_v54 }
 0x34b   :  { %v1570_v33 = vpop.eup %1569  ;;  %v842_v22 = vmul.f32 %v1568_v29, %v800_v3  ;;  %v969_v10 = vrot.slane %v968_v0, 4  ;;  %v815_v14 = vpop.xlane.xlu1 %814 }
 0x34c   :  { %v1572_v34 = vpop.eup %1571  ;;  %v834_v36 = vmul.f32 %v1570_v33, %v776_v5  ;;  %v907_v5 = vmul.f32 %v2014_v7, %v891_v55  ;;  %v921_v18 = vadd.f32 %v920_v62, %v919_v53  ;;  %v896_v23 = vmul.f32 %v2020_v16, %v880_v2 }
 0x34d   :  { %v835_v43 = vmul.f32 %v1572_v34, %v779_v60  ;;  %v858_v56 = vsub.f32 2.0, %v842_v22  ;;  %v2084_v60 = vpop.xlane.xlu0 %790  ;;  %v970_v35 = vadd.f32 %v969_v10, %v968_v0  ;;  %1581 = vrcp.f32 %v815_v14 }
 0x34e   :  { %v850_v50 = vsub.f32 2.0, %v834_v36  ;;  %v1574_v52 = vpop.eup %1573  ;;  %v912_v22 = vsel %vm671_vm1, %v896_v23, 0.0  ;;  %1583 = vrcp.f32 %v2084_v60 }
 0x34f   :  { %v851_v59 = vsub.f32 2.0, %v835_v43  ;;  %v1576_v61 = vpop.eup %1575  ;;  %v837_v1 = vmul.f32 %v1574_v52, %v785_v11  ;;  %v874_v3 = vmul.f32 %v1568_v29, %v858_v56  ;;  %v989_v11 = vsel %vm671_vm1, %v907_v5, 0.0 }
 0x350   :  { %v866_v57 = vmul.f32 %v1570_v33, %v850_v50  ;;  %v844_v13 = vmul.f32 %v1576_v61, %v806_v17  ;;  %v978_v33 = vrot.slane %v977_v9, 2  ;;  %v922_v17 = vrot.slane %v921_v18, 2 }
 0x351   :  { %v867_v12 = vmul.f32 %v1572_v34, %v851_v59  ;;  %v853_v15 = vsub.f32 2.0, %v837_v1  ;;  %v890_v25 = vmul.f32 0.125, %v874_v3  ;;  %v2090_v7 = vpop.xlane.xlu0 %787  ;;  %v990_v16 = vrot.slane %v989_v11, 4 }
 0x352   :  { %v1578_v4 = vpop.eup %1577  ;;  %v882_v6 = vmul.f32 0.125, %v866_v57  ;;  %v860_v26 = vsub.f32 2.0, %v844_v13  ;;  %v979_v46 = vadd.f32 %v978_v33, %v977_v9  ;;  %v971_v47 = vrot.slane %v970_v35, 2 }
 0x353   :  { %v1580_v8 = vpop.eup %1579  ;;  %v845_v27 = vmul.f32 %v1578_v4, %v809_v28  ;;  %v883_v24 = vmul.f32 0.125, %v867_v12  ;;  %v869_v36 = vmul.f32 %v1574_v52, %v853_v15  ;;  %v906_v42 = vmul.f32 %v2032_v30, %v890_v25 }
 0x354   :  { %v898_v21 = vmul.f32 %v2035_v32, %v882_v6  ;;  %v836_v29 = vmul.f32 %v1580_v8, %v782_v31  ;;  %v876_v34 = vmul.f32 %v1576_v61, %v860_v26  ;;  %v923_v55 = vadd.f32 %v922_v17, %v921_v18 }
 0x355   :  { %v861_v38 = vsub.f32 2.0, %v845_v27  ;;  %v899_v50 = vmul.f32 %v2024_v19, %v883_v24  ;;  %v885_v52 = vmul.f32 0.125, %v869_v36  ;;  %v812_v56 = vpop.xlane.xlu0 %811  ;;  %v913_v57 = vrot.slane %v912_v22, 4 }
 0x356   :  { %v852_v39 = vsub.f32 2.0, %v836_v29  ;;  %v926_v32 = vsel %vm671_vm1, %v898_v21, 0.0  ;;  %v892_v28 = vmul.f32 0.125, %v876_v34  ;;  %1585 = vrcp.f32 %v2090_v7 }
 0x357   :  { %v877_v31 = vmul.f32 %v1578_v4, %v861_v38  ;;  %v927_v58 = vrot.slane %v926_v32, 4  ;;  %v991_v30 = vadd.f32 %v990_v16, %v989_v11  ;;  %v982_v59 = vsel %vm671_vm1, %v906_v42, 0.0  ;;  %v1582_v12 = vpop.eup %1581 }
 0x358   :  { %v868_v43 = vmul.f32 %v1580_v8, %v852_v39  ;;  %v908_v61 = vmul.f32 %v2042_v37, %v892_v28  ;;  %v980_v0 = vrot.slane %v979_v46, 1  ;;  %v972_v1 = vadd.f32 %v971_v47, %v970_v35  ;;  %v1584_v25 = vpop.eup %1583 }
 0x359   :  { %v893_v53 = vmul.f32 0.125, %v877_v31  ;;  %1587 = vrcp.f32 %v812_v56  ;;  %v933_v19 = vsel %vm671_vm1, %v899_v50, 0.0  ;;  %v901_v2 = vmul.f32 %v2044_v20, %v885_v52 }
 0x35a   :  { %v884_v54 = vmul.f32 0.125, %v868_v43  ;;  %v914_v5 = vadd.f32 %v913_v57, %v912_v22  ;;  %v983_v6 = vrot.slane %v982_v59, 4  ;;  %v928_v8 = vadd.f32 %v927_v58, %v926_v32 }
 0x35b   :  { %v909_v3 = vmul.f32 %v2052_v41, %v893_v53  ;;  %v924_v9 = vrot.slane %v923_v55, 1  ;;  %v992_v10 = vrot.slane %v991_v30, 2  ;;  %v996_v37 = vsel %vm671_vm1, %v908_v61, 0.0 }
 0x35c   :  { %v900_v62 = vmul.f32 %v2050_v40, %v884_v54  ;;  %v2106_v40 = vadd.f32 %v980_v0, %v979_v46  ;;  %v934_v13 = vrot.slane %v933_v19, 4  ;;  %v973_v15 = vrot.slane %v972_v1, 1 }
 0x35d   :  { %v947_v23 = vsel %vm671_vm1, %v901_v2, 0.0  ;;  %v1003_v20 = vsel %vm671_vm1, %v909_v3, 0.0  ;;  %v847_v41 = vmul.f32 %v1582_v12, %v815_v14  ;;  %v915_v26 = vrot.slane %v914_v5, 2 }
 0x35e   :  { %v940_v4 = vsel %vm671_vm1, %v900_v62, 0.0  ;;  %v984_v11 = vadd.f32 %v983_v6, %v982_v59  ;;  %v929_v21 = vrot.slane %v928_v8, 2  ;;  %v997_v27 = vrot.slane %v996_v37, 4 }
 0x35f   :  { %v941_v18 = vrot.slane %v940_v4, 4  ;;  %v2110_v29 = vadd.f32 %v924_v9, %v923_v55  ;;  %v2112_v33 = vadd.f32 %v992_v10, %v991_v30  ;;  %v863_v35 = vsub.f32 2.0, %v847_v41 }
 0x360   :  { %v839_v24 = vmul.f32 %v1584_v25, %v2084_v60  ;;  %v1586_v34 = vpop.eup %1585  ;;  %v935_v17 = vadd.f32 %v934_v13, %v933_v19  ;;  %v948_v36 = vrot.slane %v947_v23, 4  ;;  %v1004_v38 = vrot.slane %v1003_v20, 4 }
 0x361   :  { %v942_v39 = vadd.f32 %v941_v18, %v940_v4  ;;  %v2115_v16 = vadd.f32 %v973_v15, %v972_v1  ;;  %v879_v14 = vmul.f32 %v1582_v12, %v863_v35  ;;  %v838_v42 = vmul.f32 %v1586_v34, %v2090_v7 }
 0x362   :  { %v855_v22 = vsub.f32 2.0, %v839_v24  ;;  %v916_v28 = vadd.f32 %v915_v26, %v914_v5  ;;  %v985_v31 = vrot.slane %v984_v11, 2  ;;  %v930_v43 = vadd.f32 %v929_v21, %v928_v8 }
 0x363   :  { %v1588_v32 = vpop.eup %1587  ;;  %v998_v46 = vadd.f32 %v997_v27, %v996_v37  ;;  %v895_v47 = vmul.f32 0.125, %v879_v14  ;;  %v854_v52 = vsub.f32 2.0, %v838_v42  ;;  %v936_v53 = vrot.slane %v935_v17, 2 }
 0x364   :  { %v871_v50 = vmul.f32 %v1584_v25, %v855_v22  ;;  %v846_v60 = vmul.f32 %v1588_v32, %v812_v56  ;;  %v949_v54 = vadd.f32 %v948_v36, %v947_v23  ;;  %v1005_v55 = vadd.f32 %v1004_v38, %v1003_v20 }
 0x365   :  { %v943_v57 = vrot.slane %v942_v39, 2  ;;  %v911_v58 = vmul.f32 %v2060_v45, %v895_v47  ;;  %v870_v59 = vmul.f32 %v1586_v34, %v854_v52  ;;  %v917_v61 = vrot.slane %v916_v28, 1 }
 0x366   :  { %v887_v30 = vmul.f32 0.125, %v871_v50  ;;  %v862_v7 = vsub.f32 2.0, %v846_v60  ;;  %v986_v62 = vadd.f32 %v985_v31, %v984_v11  ;;  %v931_v0 = vrot.slane %v930_v43, 1 }
 0x367   :  { %v999_v1 = vrot.slane %v998_v46, 2  ;;  %v1017_v19 = vsel %vm671_vm1, %v911_v58, 0.0  ;;  %v886_v56 = vmul.f32 0.125, %v870_v59  ;;  %v937_v4 = vadd.f32 %v936_v53, %v935_v17 }
 0x368   :  { %v903_v2 = vmul.f32 %v2058_v44, %v887_v30  ;;  %v878_v3 = vmul.f32 %v1588_v32, %v862_v7  ;;  %v950_v5 = vrot.slane %v949_v54, 2  ;;  %v944_v6 = vadd.f32 %v943_v57, %v942_v39 }
 0x369   :  { %v1018_v8 = vrot.slane %v1017_v19, 4  ;;  %v1006_v9 = vrot.slane %v1005_v55, 2  ;;  %v902_v10 = vmul.f32 %v2066_v49, %v886_v56  ;;  %v918_v12 = vadd.f32 %v917_v61, %v916_v28 }
 0x36a   :  { %v961_v45 = vsel %vm671_vm1, %v903_v2, 0.0  ;;  %v894_v37 = vmul.f32 0.125, %v878_v3  ;;  %v987_v13 = vrot.slane %v986_v62, 1  ;;  %v932_v23 = vadd.f32 %v931_v0, %v930_v43 }
 0x36b   :  { %v1019_v18 = vadd.f32 %v1018_v8, %v1017_v19  ;;  %v962_v15 = vrot.slane %v961_v45, 4  ;;  %v1000_v20 = vadd.f32 %v999_v1, %v998_v46  ;;  %v954_v44 = vsel %vm671_vm1, %v902_v10, 0.0  ;;  %v1223_v10 = vld [vmem:[%s2190_s11 + $0x8] sm:$0xff] }
 0x36c   :  { %v910_v41 = vmul.f32 %v2070_v51, %v894_v37  ;;  %v938_v25 = vrot.slane %v937_v4, 1  ;;  %v945_v26 = vrot.slane %v944_v6, 1  ;;  %v955_v21 = vrot.slane %v954_v44, 4 }
 0x36d   :  { %v963_v11 = vadd.f32 %v962_v15, %v961_v45  ;;  %v951_v27 = vadd.f32 %v950_v5, %v949_v54  ;;  %v1007_v35 = vadd.f32 %v1006_v9, %v1005_v55  ;;  %v1020_v24 = vrot.slane %v1019_v18, 2  ;;  %v1222_v45 = vld [vmem:[%s2190_s11] sm:$0xff] }
 0x36e   :  { %v1010_v49 = vsel %vm671_vm1, %v910_v41, 0.0  ;;  %v1033_v34 = vsel %vm1032_vm4, %v2110_v29, %v918_v12  ;;  %v956_v36 = vadd.f32 %v955_v21, %v954_v44  ;;  %v994_v39 = vrot.slane %v2112_v33, 1 }
 0x36f   :  { %v964_v17 = vrot.slane %v963_v11, 2  ;;  %v1011_v38 = vrot.slane %v1010_v49, 4  ;;  %v988_v14 = vadd.f32 %v987_v13, %v986_v62  ;;  %v1035_v51 = vsel %vm1034_vm3, %v932_v23, %v1033_v34 }
 0x370   :  { %v1001_v22 = vrot.slane %v1000_v20, 1  ;;  %v946_v42 = vadd.f32 %v945_v26, %v944_v6  ;;  %v957_v28 = vrot.slane %v956_v36, 2  ;;  %v939_v43 = vadd.f32 %v938_v25, %v937_v4 }
 0x371   :  { %v965_v32 = vadd.f32 %v964_v17, %v963_v11  ;;  %v1012_v31 = vadd.f32 %v1011_v38, %v1010_v49  ;;  %v952_v46 = vrot.slane %v951_v27, 1  ;;  %v1008_v47 = vrot.slane %v1007_v35, 1 }
 0x372   :  { %v1021_v50 = vadd.f32 %v1020_v24, %v1019_v18  ;;  %v1126_v29 = vsel %vm1032_vm4, %v2106_v40, %v2115_v16  ;;  %v958_v52 = vadd.f32 %v957_v28, %v956_v36  ;;  %v1037_v54 = vsel %vm1036_vm5, %v939_v43, %v1035_v51  ;;  %v1205_v18 = vld [vmem:[#allocation8] sm:$0xff] }
 0x373   :  { %v1013_v60 = vrot.slane %v1012_v31, 2  ;;  %v966_v53 = vrot.slane %v965_v32, 1  ;;  %v1127_v55 = vsel %vm1034_vm3, %v988_v14, %v1126_v29  ;;  %v1002_v57 = vadd.f32 %v1001_v22, %v1000_v20 }
 0x374   :  { %v959_v58 = vrot.slane %v958_v52, 1  ;;  %v1039_v59 = vsel %vm1038_vm6, %v946_v42, %v1037_v54  ;;  %v995_v7 = vadd.f32 %v994_v39, %v2112_v33  ;;  %v953_v61 = vadd.f32 %v952_v46, %v951_v27  ;;  %v1356_v42 = vld [vmem:[%s2191_s12] ss:$0 sm:$0xff] }
 0x375   :  { %v1014_v30 = vadd.f32 %v1013_v60, %v1012_v31  ;;  %v1009_v62 = vadd.f32 %v1008_v47, %v1007_v35  ;;  %v1022_v0 = vrot.slane %v1021_v50, 1  ;;  %v967_v1 = vadd.f32 %v966_v53, %v965_v32 }
 0x376   :  { %v960_v40 = vadd.f32 %v959_v58, %v958_v52  ;;  %v1041_v19 = vsel %vm1040_vm7, %v953_v61, %v1039_v59  ;;  %v1128_v2 = vsel %vm1036_vm5, %v995_v7, %v1127_v55  ;;  %v1510_v37 = vpack.c.bf16 %v1223_v10, %v1222_v45 }
 0x377   :  { %v1015_v16 = vrot.slane %v1014_v30, 1  ;;  %v1129_v4 = vsel %vm1038_vm6, %v1002_v57, %v1128_v2  ;;  %v1023_v6 = vadd.f32 %v1022_v0, %v1021_v50  ;;  %v1715_v12 = vmov 0.0|0.0  }
 0x378   :  { %v1043_v56 = vsel %vm1042_vm8, %v960_v40, %v1041_v19  ;;  %v1130_v33 = vsel %vm1040_vm7, %v1009_v62, %v1129_v4  ;;  %1509 = vmatprep.subr.bf16.mxu0 %v1715_v12 }
 0x379   :  { %v1016_v3 = vadd.f32 %v1015_v16, %v1014_v30  ;;  %v1045_v5 = vsel %vm1044_vm9, %v967_v1, %v1043_v56  ;;  %1511 = vmatpush3.bf16.msra.mxu0 %v1510_v37 }
 0x37a   :  { %1467 = vmatmul.mubr.msk.f32.vlgmr.msra.gmra.mrb[10].mxu1 %vm671_vm1, %v1045_v5  ;;  %1512 = vmatprep.subr.bf16.mxu0 %v1715_v12 }
 0x37b   :  { %v1131_v8 = vsel %vm1042_vm8, %v1016_v3, %v1130_v33  ;;  %1470 = vmatpush3.msra.mxu1 %v1947_v63  ;;  %1471 = vmatprep.mubr.msk.f32.mxu1 %vm1714_vm2, %v1713_v48  ;;  %v1224_v48 = vld [vmem:[%s2190_s11 + $0x10] sm:$0xff]  ;;  %v1225_v63 = vld [vmem:[%s2190_s11 + $0x18] sm:$0xff] }
 0x37c   :  { %v1132_v9 = vsel %vm1044_vm9, %v1023_v6, %v1131_v8  ;;  %v1513_v13 = vpack.c.bf16 %v1225_v63, %v1224_v48 }
 0x37e   :  { %1472 = vmatmul.mubr.msk.f32.vlgmr.msra.gmra.mrb[12].mxu1 %vm671_vm1, %v1132_v9  ;;  %1514 = vmatpush3.bf16.msra.mxu0 %v1513_v13 }
 0x44d   :  { %v1114_v15 = vpop.f32.mrb[10].mxu1 }
 0x44e   :  { %v1206_v23 = vmul.f32 %v1205_v18, %v1114_v15  ;;  %v1468_v20 = vpop.f32.mrb[11].mxu1 }
 0x450   :  { %v1208_v44 = vsel %vm115_vm0, %v1206_v23, 0.0 }
 0x451   :  { %v1209_v41 = vrot.slane %v1208_v44, 4  ;;  %v1201_v25 = vpop.f32.mrb[12].mxu1 }
 0x452   :  { %v1207_v26 = vmul.f32 %v1205_v18, %v1201_v25  ;;  %v1473_v11 = vpop.f32.mrb[13].mxu1 }
 0x453   :  { %v1210_v21 = vadd.f32 %v1209_v41, %v1208_v44 }
 0x454   :  { %v1215_v27 = vsel %vm115_vm0, %v1207_v26, 0.0 }
 0x455   :  { %v1211_v35 = vrot.slane %v1210_v21, 2  ;;  %v1216_v24 = vrot.slane %v1215_v27, 4 }
 0x457   :  { %v1212_v49 = vadd.f32 %v1211_v35, %v1210_v21  ;;  %v1217_v34 = vadd.f32 %v1216_v24, %v1215_v27 }
 0x459   :  { %v1218_v17 = vrot.slane %v1217_v34, 2  ;;  %v1213_v36 = vrot.slane %v1212_v49, 1 }
 0x45b   :  { %v1219_v38 = vadd.f32 %v1218_v17, %v1217_v34  ;;  %v1214_v14 = vadd.f32 %v1213_v36, %v1212_v49 }
 0x45d   :  { %v1220_v39 = vrot.slane %v1219_v38, 1 }
 0x45f   :  { %v1221_v51 = vadd.f32 %v1220_v39, %v1219_v38 }
 0x461   :  { %v1235_v22 = vsel %vm1032_vm4, %v1221_v51, %v1214_v14 }
 0x462   :  { %1483 = vmatmul.mubr.msk.f32.vlgmr.msra.gmra.mrb[12].mxu0 %vm115_vm0, %v1235_v22 }
 0x535   :  { %v1304_v32 = vpop.f32.mrb[12].mxu0 }
 0x536   :  { %v1305_v28 = vadd.f32 %v1356_v42, %v1304_v32  ;;  %v1484_v31 = vpop.f32.mrb[13].mxu0 }
 0x538   :  { %1309 = vst.msk [vmem:[#allocation10] sm:$0x3] %vm1308_vm10, %v1305_v28 }
 0x539   :  { %1688 = shalt.err (!%p1685_p8)
}
 0x53a   :  { %s1689_s6 = scalar_lea.hbm %s2192_s13, 32 }
 0x53b   :  { %p1690_p9 = scmp.ne.s32.totalorder %s2192_s13, %s1689_s6  ;;  %p1693_p10 = scmp.lt.u32.totalorder %s1689_s6, %s2192_s13 }
 0x53d   :  { %p1695_p11 = pnand %p1693_p10, %p1690_p9 }
 0x53f   :  { %1698 = shalt.err (!%p1695_p11)
}
 0x540   :  { %1319 = dma.vmem_to_hbm [thread:$0]  %s1317_s30, 32, %s2192_s13, [#allocation4]  }
 0x541   :  { %1705 = dma.done.wait [#allocation4], 32  }
 0x542   :  { %1706 = vsyncadd [#allocation4], 4294967264 }
 0x543   :  { %1323 = vsyncpa [#allocation3], 1 }
 0x544   :  { %1324 = vsyncpa [#allocation6], 1 }
 0x545   :  { %1325 = vsyncpa [#allocation9], 1 }
 0x546   :  { %1326 = vsyncpa [#allocation4], 1 }

</bundles_post_ra>
